<compile_context>
chip_gen: v6e
topology: v6e:2x2x1
jax: 0.10.0
libtpu: 0.0.40
codegen_flags: <defaults>
</compile_context>

<pallas_src>
import functools

import jax
import jax.numpy as jnp
from jax.experimental import pallas as pl
from jax.experimental.pallas import tpu as pltpu


def _dice(x, scale, shift, alpha, beta, *, bf16_gate):
    # Dice(x) = p*x + (1-p)*alpha*x = x * (alpha + p*beta), beta = 1-alpha (pre-folded),
    # p = sigmoid((x - mean) * rsqrt(var + eps)) = sigmoid(x*scale + shift)  (running stats).
    if bf16_gate:
        xb = x.astype(jnp.bfloat16)
        p = jax.nn.sigmoid(xb * scale.astype(jnp.bfloat16) + shift.astype(jnp.bfloat16))
        p = p.astype(jnp.float32)
    else:
        p = jax.nn.sigmoid(x * scale + shift)
    return x * (alpha + p * beta)


def _din_kernel(lens_ref, hist_ref, cand_ref,
                wa1hp_ref, wa1c_ref, attv_ref,
                w1_ref, h1v_ref, w2_ref, h2v_ref,
                out_ref, *, bf16_elem):
    Bt, T, D = hist_ref.shape
    h = hist_ref[...]                        # (Bt, T, D) bf16 history embeddings
    c = cand_ref[...]                        # (Bt, D)    bf16 candidate embedding

    # ---- attention unit: MLP([h, c, h-c, h*c]) with the concat folded into the weights ----
    # feat @ wa1 == [h, h*c] @ [[W_h + W_d], [W_p]] + broadcast_T(c @ (W_c - W_d))
    hc = h * c[:, None, :]                                        # h*c term (bf16, feeds MXU)
    x = jnp.concatenate([h, hc], axis=-1).reshape(Bt * T, 2 * D)  # one fused K=2D MXU operand
    a = jnp.dot(x, wa1hp_ref[...],
                preferred_element_type=jnp.float32).reshape(Bt, T, -1)        # (Bt, T, Ha)
    a_c = jnp.dot(c, wa1c_ref[...], preferred_element_type=jnp.float32)       # once per row

    attv = attv_ref[...]                     # (6, Ha) f32 packed per-channel params
    ba1, a_scale, a_shift, a_alpha, a_beta, wa2r = (attv[r] for r in range(6))
    a = a + a_c[:, None, :] + ba1
    a = _dice(a, a_scale, a_shift, a_alpha, a_beta, bf16_gate=bf16_elem)

    # scores: (Ha -> 1) projection as VPU multiply + lane reduce (MXU with N=1 wastes 127/128).
    # 1/sqrt(D) is pre-folded into wa2r in the wrapper; ba2 cancels under the softmax.
    scores = jnp.sum(a * wa2r, axis=-1)                           # (Bt, T) lane-dense f32

    # masked softmax over history positions; mask built from int32 lengths (no (B,T,1) stream).
    t_idx = jax.lax.broadcasted_iota(jnp.int32, (Bt, T), 1)
    valid = t_idx < lens_ref[...]                                 # (Bt, T)
    scores = jnp.where(valid, scores, -1e30)
    m = jnp.max(scores, axis=-1, keepdims=True)
    e = jnp.exp(scores - m)
    w = e * pl.reciprocal(jnp.sum(e, axis=-1, keepdims=True), approx=True)

    # weighted pooling of the history; multiply in bf16 on v6e/v7x, f32 T-accumulation always.
    if bf16_elem:
        prod = (w.astype(jnp.bfloat16)[:, :, None] * h).astype(jnp.float32)
    else:
        prod = w[:, :, None] * h.astype(jnp.float32)
    interest = jnp.sum(prod, axis=1)                              # (Bt, D) pooled interest, f32

    # ---- head MLP with Dice; concat([interest, cand]) fed as one (Bt, 2D) MXU operand ----
    h1v = h1v_ref[...]
    b1, s1, t1, al1, be1 = (h1v[r] for r in range(5))
    h2v = h2v_ref[...]
    b2, s2, t2, al2, be2, w3r = (h2v[r] for r in range(6))

    feat = jnp.concatenate([interest.astype(jnp.bfloat16), c], axis=-1)       # (Bt, 2D)
    f1 = jnp.dot(feat, w1_ref[...], preferred_element_type=jnp.float32) + b1
    f1 = _dice(f1, s1, t1, al1, be1, bf16_gate=bf16_elem)
    f2 = jnp.dot(f1.astype(jnp.bfloat16), w2_ref[...],
                 preferred_element_type=jnp.float32) + b2
    f2 = _dice(f2, s2, t2, al2, be2, bf16_gate=bf16_elem)

    # final (H2 -> 1) projection as VPU multiply + lane reduce; b3 is added in the wrapper.
    logit = jnp.sum(f2 * w3r, axis=-1)                            # (Bt,)
    out_ref[...] = logit.reshape(1, 1, Bt)                        # lane-dense store


def _vmem_limit_bytes():
    try:
        cap = int(pltpu.get_tpu_info().vmem_capacity_bytes)
    except Exception:
        cap = 64 * 1024 * 1024            # conservative fallback (v7x per-TC VMEM)
    # v5e/v6e (128 MiB) -> ~96 MiB; v7x (64 MiB) -> 48 MiB.
    return max(32 << 20, min((cap * 3) // 4, 100 << 20))


def _choose_tiling(B, T, D, Ha, vmem_limit):
    # Rough per-batch-row VMEM bytes of the streamed inputs + in-kernel working set:
    # double-buffered bf16 hist, h*c + fused [h, h*c] operand, f32 attention activations,
    # Dice/softmax temporaries, f32 pooling product.
    per_row = T * (14 * D + 8 * Ha + 16) + 64 * D
    budget = vmem_limit // 2              # leave headroom for weights / compiler scratch
    bt_cap = max(16, budget // max(per_row, 1))
    bt = 16
    for cand in (512, 256, 128, 64, 32, 16):
        if cand <= bt_cap:
            bt = cand
            break
    # Guarantee >= 2 grid steps (megacore split on v7x; DMA/compute pipelining everywhere).
    while bt > 16 and pl.cdiv(B, bt) < 2:
        bt //= 2
    b_pad = max(pl.cdiv(B, bt), 2) * bt
    return bt, b_pad


def din_dice_whole_forward(params, hist_ids, hist_lens, target_ids):
    """Glue: embedding gathers + weight re-parameterization in plain JAX, hot path in Pallas."""
    emb = params['emb']
    B, T = hist_ids.shape
    D = emb.shape[1]
    Ha = params['wa1'].shape[1]
    eps = 1e-8

    hist = emb[hist_ids].astype(jnp.bfloat16)          # (B, T, D) embedding gather (plain JAX glue)
    cand = emb[target_ids].astype(jnp.bfloat16)        # (B, D)
    lens = hist_lens.astype(jnp.int32).reshape(B, 1)   # per-row valid history lengths (>= 1)

    # bf16 Dice gate / pooling multiply only where a bf16 VPU/EUP path exists (v6e, v7x).
    try:
        kind = jax.devices()[0].device_kind.lower()
    except Exception:
        kind = ""
    bf16_elem = ("v6" in kind) or ("v7" in kind)

    vmem_limit = _vmem_limit_bytes()
    Bt, B_pad = _choose_tiling(B, T, D, Ha, vmem_limit)
    T_pad = pl.cdiv(T, 16) * 16                        # bf16 sublane alignment for reshapes

    if T_pad != T:
        hist = jnp.pad(hist, ((0, 0), (0, T_pad - T), (0, 0)))
    if B_pad != B:
        hist = jnp.pad(hist, ((0, B_pad - B), (0, 0), (0, 0)))
        cand = jnp.pad(cand, ((0, B_pad - B), (0, 0)))
        lens = jnp.pad(lens, ((0, B_pad - B), (0, 0)))  # padded rows get lens=0, sliced off below
    G = B_pad // Bt

    def dice_rows(mean, var, alpha):
        scale = jax.lax.rsqrt(var + eps)
        return scale[0], (-mean * scale)[0], alpha[0], (1.0 - alpha)[0]

    # attention-unit weight split: feat = [h, c, h-c, h*c] -> fused (2D,Ha) + candidate (D,Ha).
    W_h, W_c, W_d, W_p = jnp.split(params['wa1'], 4, axis=0)
    wa1hp = jnp.concatenate([W_h + W_d, W_p], axis=0).astype(jnp.bfloat16)    # (2D, Ha)
    wa1c = (W_c - W_d).astype(jnp.bfloat16)                                   # (D, Ha)
    a_s, a_t, a_a, a_b = dice_rows(params['a_mean'], params['a_var'], params['aa1'])
    # fold 1/sqrt(D) score scaling into wa2; ba2 cancels under softmax (and is zero).
    wa2r = params['wa2'][:, 0] * (1.0 / (float(D) ** 0.5))
    attv = jnp.stack([params['ba1'][0], a_s, a_t, a_a, a_b, wa2r], axis=0)    # (6, Ha) f32

    # head MLP: concat([interest, candidate]) hits w1 as one (Bt, 2D) operand.
    w1 = params['w1'].astype(jnp.bfloat16)                                    # (2D, H1)
    s1, t1, al1, be1 = dice_rows(params['d1_mean'], params['d1_var'], params['al1'])
    h1v = jnp.stack([params['b1'][0], s1, t1, al1, be1], axis=0)              # (5, H1) f32
    w2 = params['w2'].astype(jnp.bfloat16)                                    # (H1, H2)
    s2, t2, al2, be2 = dice_rows(params['d2_mean'], params['d2_var'], params['al2'])
    h2v = jnp.stack([params['b2'][0], s2, t2, al2, be2, params['w3'][:, 0]],
                    axis=0)                                                   # (6, H2) f32

    def batch3(i): return (i, 0, 0)
    def batch2(i): return (i, 0)
    def resident(i): return (0, 0)      # same block every step -> weight stays VMEM-resident

    weight_args = [wa1hp, wa1c, attv, w1, h1v, w2, h2v]
    weight_specs = [pl.BlockSpec(w.shape, resident) for w in weight_args]

    kernel = functools.partial(_din_kernel, bf16_elem=bf16_elem)

    out = pl.pallas_call(
        kernel,
        out_shape=jax.ShapeDtypeStruct((G, 1, Bt), jnp.float32),   # lane-dense logits slab
        grid_spec=pltpu.PrefetchScalarGridSpec(
            num_scalar_prefetch=0,
            grid=(G,),
            in_specs=([pl.BlockSpec((Bt, 1), batch2),              # lens
                       pl.BlockSpec((Bt, T_pad, D), batch3),       # hist
                       pl.BlockSpec((Bt, D), batch2)]              # cand
                      + weight_specs),
            out_specs=pl.BlockSpec((1, 1, Bt), batch3)),
        compiler_params=pltpu.CompilerParams(
            dimension_semantics=("parallel",),                     # megacore sharding on v7x
            vmem_limit_bytes=vmem_limit),
    )(lens, hist, cand, *weight_args)

    # un-pad, restore (B, 1) shape, add the final bias outside the kernel.
    return out.reshape(B_pad, 1)[:B] + params['b3']


def init_params(key, vocab=100, D=16, Ha=32, H1=64, H2=32):
    ks = jax.random.split(key, 6)
    s = 0.1
    return {
        'emb': jax.random.normal(ks[0], (vocab, D), jnp.float32) * s,
        # attention unit: [h, c, h-c, h*c] (4D) -> Ha -> 1
        'wa1': jax.random.normal(ks[1], (4 * D, Ha), jnp.float32) * s,
        'ba1': jnp.zeros((1, Ha), jnp.float32),
        'aa1': jnp.full((1, Ha), 0.25, jnp.float32),
        'a_mean': jnp.zeros((1, Ha), jnp.float32),   # Dice running stats (inference mode)
        'a_var': jnp.ones((1, Ha), jnp.float32),
        'wa2': jax.random.normal(ks[2], (Ha, 1), jnp.float32) * s,
        'ba2': jnp.zeros((1, 1), jnp.float32),       # cancels under softmax; folded out
        # head MLP: [interest, candidate] (2D) -> H1 -> H2 -> 1
        'w1': jax.random.normal(ks[3], (2 * D, H1), jnp.float32) * s,
        'b1': jnp.zeros((1, H1), jnp.float32),
        'al1': jnp.full((1, H1), 0.25, jnp.float32),
        'd1_mean': jnp.zeros((1, H1), jnp.float32),
        'd1_var': jnp.ones((1, H1), jnp.float32),
        'w2': jax.random.normal(ks[4], (H1, H2), jnp.float32) * s,
        'b2': jnp.zeros((1, H2), jnp.float32),
        'al2': jnp.full((1, H2), 0.25, jnp.float32),
        'd2_mean': jnp.zeros((1, H2), jnp.float32),
        'd2_var': jnp.ones((1, H2), jnp.float32),
        'w3': jax.random.normal(ks[5], (H2, 1), jnp.float32) * s,
        'b3': jnp.zeros((1, 1), jnp.float32),
    }


if __name__ == "__main__":
    key = jax.random.PRNGKey(0)
    pkey, dkey = jax.random.split(key)

    B, T, D, VOCAB = 8, 8, 16, 100
    params = init_params(pkey, vocab=VOCAB, D=D)

    hist_ids = jax.random.randint(dkey, (B, T), 0, VOCAB, jnp.int32)
    target_ids = jax.random.randint(jax.random.fold_in(dkey, 1), (B,), 0, VOCAB, jnp.int32)
    hist_lens = (jnp.arange(B, dtype=jnp.int32) % T) + 1   # deterministic valid lengths in [1, T]

    out = jax.jit(din_dice_whole_forward)(params, hist_ids, hist_lens, target_ids)
    out = jax.block_until_ready(out)
    assert out.shape == (B, 1) and out.dtype == jnp.float32
    assert bool(jnp.all(jnp.isfinite(out)))
    print("KERNEL_OK")
</pallas_src>

<mosaic_0001>
module attributes {stable_mosaic.version = 11 : i64} {
  func.func @_din_kernel(%arg0: i32, %arg1: memref<16x1xi32, #tpu.memory_space<vmem>>, %arg2: memref<16x16x16xbf16, #tpu.memory_space<vmem>>, %arg3: memref<16x16xbf16, #tpu.memory_space<vmem>>, %arg4: memref<32x32xbf16, #tpu.memory_space<vmem>>, %arg5: memref<16x32xbf16, #tpu.memory_space<vmem>>, %arg6: memref<6x32xf32, #tpu.memory_space<vmem>>, %arg7: memref<32x64xbf16, #tpu.memory_space<vmem>>, %arg8: memref<5x64xf32, #tpu.memory_space<vmem>>, %arg9: memref<64x32xbf16, #tpu.memory_space<vmem>>, %arg10: memref<6x32xf32, #tpu.memory_space<vmem>>, %arg11: memref<1x1x16xf32, #tpu.memory_space<vmem>>) attributes {dimension_semantics = [#tpu.dimension_semantics<parallel>], iteration_bounds = array<i64: 2>, scalar_prefetch = 0 : i64, scratch_operands = 0 : i64, tpu.core_type = #tpu.core_type<tc>, window_params = [{transform_indices = @transform_0, window_bounds = array<i64: 16, 1>}, {transform_indices = @transform_1, window_bounds = array<i64: 16, 16, 16>}, {transform_indices = @transform_2, window_bounds = array<i64: 16, 16>}, {pipeline_mode = #tpu.pipeline_mode<synchronous>, transform_indices = @transform_3, window_bounds = array<i64: 32, 32>}, {pipeline_mode = #tpu.pipeline_mode<synchronous>, transform_indices = @transform_4, window_bounds = array<i64: 16, 32>}, {pipeline_mode = #tpu.pipeline_mode<synchronous>, transform_indices = @transform_5, window_bounds = array<i64: 6, 32>}, {pipeline_mode = #tpu.pipeline_mode<synchronous>, transform_indices = @transform_6, window_bounds = array<i64: 32, 64>}, {pipeline_mode = #tpu.pipeline_mode<synchronous>, transform_indices = @transform_7, window_bounds = array<i64: 5, 64>}, {pipeline_mode = #tpu.pipeline_mode<synchronous>, transform_indices = @transform_8, window_bounds = array<i64: 64, 32>}, {pipeline_mode = #tpu.pipeline_mode<synchronous>, transform_indices = @transform_9, window_bounds = array<i64: 6, 32>}, {transform_indices = @transform_10, window_bounds = array<i64: 1, 1, 16>}]} {
    %c0 = arith.constant 0 : index
    %c0_0 = arith.constant 0 : index
    %c0_1 = arith.constant 0 : index
    %0 = vector.load %arg2[%c0, %c0_0, %c0_1] : memref<16x16x16xbf16, #tpu.memory_space<vmem>>, vector<16x16x16xbf16>
    %c0_2 = arith.constant 0 : index
    %c0_3 = arith.constant 0 : index
    %1 = vector.load %arg3[%c0_2, %c0_3] : memref<16x16xbf16, #tpu.memory_space<vmem>>, vector<16x16xbf16>
    %2 = vector.shape_cast %1 : vector<16x16xbf16> to vector<16x1x16xbf16>
    %3 = vector.broadcast %2 : vector<16x1x16xbf16> to vector<16x16x16xbf16>
    %4 = arith.mulf %0, %3 : vector<16x16x16xbf16>
    %5 = tpu.concatenate %0, %4 in 2 : vector<16x16x16xbf16>, vector<16x16x16xbf16> -> vector<16x16x32xbf16>
    %6 = vector.shape_cast %5 : vector<16x16x32xbf16> to vector<256x32xbf16>
    %c0_4 = arith.constant 0 : index
    %c0_5 = arith.constant 0 : index
    %7 = vector.load %arg4[%c0_4, %c0_5] : memref<32x32xbf16, #tpu.memory_space<vmem>>, vector<32x32xbf16>
    %cst = arith.constant dense<0.000000e+00> : vector<256x32xf32>
    %8 = tpu.matmul %6, %7, %cst {dimension_numbers = #tpu.dot_dimension_numbers<[1], [0], [0], [1], [0, 0, 1, 1], [], []>} : vector<256x32xbf16>, vector<32x32xbf16>, vector<256x32xf32> -> vector<256x32xf32>
    %9 = vector.shape_cast %8 : vector<256x32xf32> to vector<16x16x32xf32>
    %c0_6 = arith.constant 0 : index
    %c0_7 = arith.constant 0 : index
    %10 = vector.load %arg5[%c0_6, %c0_7] : memref<16x32xbf16, #tpu.memory_space<vmem>>, vector<16x32xbf16>
    %cst_8 = arith.constant dense<0.000000e+00> : vector<16x32xf32>
    %11 = tpu.matmul %1, %10, %cst_8 {dimension_numbers = #tpu.dot_dimension_numbers<[1], [0], [0], [1], [0, 0, 1, 1], [], []>} : vector<16x16xbf16>, vector<16x32xbf16>, vector<16x32xf32> -> vector<16x32xf32>
    %c0_9 = arith.constant 0 : index
    %c0_10 = arith.constant 0 : index
    %12 = vector.load %arg6[%c0_9, %c0_10] : memref<6x32xf32, #tpu.memory_space<vmem>>, vector<6x32xf32>
    %13 = vector.extract_strided_slice %12 {offsets = [0, 0], sizes = [1, 32], strides = [1, 1]} : vector<6x32xf32> to vector<1x32xf32>
    %14 = vector.shape_cast %13 : vector<1x32xf32> to vector<32xf32>
    %15 = vector.extract_strided_slice %12 {offsets = [1, 0], sizes = [1, 32], strides = [1, 1]} : vector<6x32xf32> to vector<1x32xf32>
    %16 = vector.shape_cast %15 : vector<1x32xf32> to vector<32xf32>
    %17 = vector.extract_strided_slice %12 {offsets = [2, 0], sizes = [1, 32], strides = [1, 1]} : vector<6x32xf32> to vector<1x32xf32>
    %18 = vector.shape_cast %17 : vector<1x32xf32> to vector<32xf32>
    %19 = vector.extract_strided_slice %12 {offsets = [3, 0], sizes = [1, 32], strides = [1, 1]} : vector<6x32xf32> to vector<1x32xf32>
    %20 = vector.shape_cast %19 : vector<1x32xf32> to vector<32xf32>
    %21 = vector.extract_strided_slice %12 {offsets = [4, 0], sizes = [1, 32], strides = [1, 1]} : vector<6x32xf32> to vector<1x32xf32>
    %22 = vector.shape_cast %21 : vector<1x32xf32> to vector<32xf32>
    %23 = vector.extract_strided_slice %12 {offsets = [5, 0], sizes = [1, 32], strides = [1, 1]} : vector<6x32xf32> to vector<1x32xf32>
    %24 = vector.shape_cast %23 : vector<1x32xf32> to vector<32xf32>
    %25 = vector.shape_cast %11 : vector<16x32xf32> to vector<16x1x32xf32>
    %26 = vector.broadcast %25 : vector<16x1x32xf32> to vector<16x16x32xf32>
    %27 = arith.addf %9, %26 : vector<16x16x32xf32>
    %28 = vector.shape_cast %14 : vector<32xf32> to vector<1x1x32xf32>
    %29 = vector.broadcast %28 : vector<1x1x32xf32> to vector<16x16x32xf32>
    %30 = arith.addf %27, %29 : vector<16x16x32xf32>
    %31 = vector.shape_cast %16 : vector<32xf32> to vector<1x1x32xf32>
    %32 = vector.broadcast %31 : vector<1x1x32xf32> to vector<16x16x32xf32>
    %33 = arith.mulf %30, %32 : vector<16x16x32xf32>
    %34 = vector.shape_cast %18 : vector<32xf32> to vector<1x1x32xf32>
    %35 = vector.broadcast %34 : vector<1x1x32xf32> to vector<16x16x32xf32>
    %36 = arith.addf %33, %35 : vector<16x16x32xf32>
    %37 = arith.negf %36 : vector<16x16x32xf32>
    %38 = math.exp %37 : vector<16x16x32xf32>
    %cst_11 = arith.constant 1.000000e+00 : f32
    %39 = vector.broadcast %cst_11 : f32 to vector<16x16x32xf32>
    %40 = arith.addf %39, %38 : vector<16x16x32xf32>
    %41 = arith.divf %39, %40 : vector<16x16x32xf32>
    %42 = vector.shape_cast %22 : vector<32xf32> to vector<1x1x32xf32>
    %43 = vector.broadcast %42 : vector<1x1x32xf32> to vector<16x16x32xf32>
    %44 = arith.mulf %41, %43 : vector<16x16x32xf32>
    %45 = vector.shape_cast %20 : vector<32xf32> to vector<1x1x32xf32>
    %46 = vector.broadcast %45 : vector<1x1x32xf32> to vector<16x16x32xf32>
    %47 = arith.addf %46, %44 : vector<16x16x32xf32>
    %48 = arith.mulf %30, %47 : vector<16x16x32xf32>
    %49 = vector.shape_cast %24 : vector<32xf32> to vector<1x1x32xf32>
    %50 = vector.broadcast %49 : vector<1x1x32xf32> to vector<16x16x32xf32>
    %51 = arith.mulf %48, %50 : vector<16x16x32xf32>
    %cst_12 = arith.constant dense<0.000000e+00> : vector<16x16xf32>
    %52 = vector.multi_reduction <add>, %51, %cst_12 [2] : vector<16x16x32xf32> to vector<16x16xf32>
    %53 = tpu.iota {dimensions = array<i32: 1>} : vector<16x16xi32>
    %c0_13 = arith.constant 0 : index
    %c0_14 = arith.constant 0 : index
    %54 = vector.load %arg1[%c0_13, %c0_14] : memref<16x1xi32, #tpu.memory_space<vmem>>, vector<16x1xi32>
    %55 = vector.broadcast %54 : vector<16x1xi32> to vector<16x16xi32>
    %56 = arith.cmpi slt, %53, %55 : vector<16x16xi32>
    %cst_15 = arith.constant -1.000000e+30 : f32
    %57 = vector.broadcast %cst_15 : f32 to vector<16x16xf32>
    %58 = arith.select %56, %52, %57 : vector<16x16xi1>, vector<16x16xf32>
    %cst_16 = arith.constant dense<0xFF800000> : vector<16xf32>
    %59 = vector.multi_reduction <maximumf>, %58, %cst_16 [1] : vector<16x16xf32> to vector<16xf32>
    %60 = vector.shape_cast %59 : vector<16xf32> to vector<16x1xf32>
    %61 = vector.broadcast %60 : vector<16x1xf32> to vector<16x16xf32>
    %62 = arith.subf %58, %61 : vector<16x16xf32>
    %63 = math.exp %62 : vector<16x16xf32>
    %cst_17 = arith.constant dense<0.000000e+00> : vector<16xf32>
    %64 = vector.multi_reduction <add>, %63, %cst_17 [1] : vector<16x16xf32> to vector<16xf32>
    %65 = vector.shape_cast %64 : vector<16xf32> to vector<16x1xf32>
    %66 = tpu.reciprocal %65 {approx = true} : vector<16x1xf32> -> vector<16x1xf32>
    %67 = vector.broadcast %66 : vector<16x1xf32> to vector<16x16xf32>
    %68 = arith.mulf %63, %67 : vector<16x16xf32>
    %69 = vector.shape_cast %68 : vector<16x16xf32> to vector<16x16x1xf32>
    %70 = arith.extf %0 : vector<16x16x16xbf16> to vector<16x16x16xf32>
    %71 = vector.broadcast %69 : vector<16x16x1xf32> to vector<16x16x16xf32>
    %72 = arith.mulf %71, %70 : vector<16x16x16xf32>
    %cst_18 = arith.constant dense<0.000000e+00> : vector<16x16xf32>
    %73 = vector.multi_reduction <add>, %72, %cst_18 [1] : vector<16x16x16xf32> to vector<16x16xf32>
    %c0_19 = arith.constant 0 : index
    %c0_20 = arith.constant 0 : index
    %74 = vector.load %arg8[%c0_19, %c0_20] : memref<5x64xf32, #tpu.memory_space<vmem>>, vector<5x64xf32>
    %75 = vector.extract_strided_slice %74 {offsets = [0, 0], sizes = [1, 64], strides = [1, 1]} : vector<5x64xf32> to vector<1x64xf32>
    %76 = vector.shape_cast %75 : vector<1x64xf32> to vector<64xf32>
    %77 = vector.extract_strided_slice %74 {offsets = [1, 0], sizes = [1, 64], strides = [1, 1]} : vector<5x64xf32> to vector<1x64xf32>
    %78 = vector.shape_cast %77 : vector<1x64xf32> to vector<64xf32>
    %79 = vector.extract_strided_slice %74 {offsets = [2, 0], sizes = [1, 64], strides = [1, 1]} : vector<5x64xf32> to vector<1x64xf32>
    %80 = vector.shape_cast %79 : vector<1x64xf32> to vector<64xf32>
    %81 = vector.extract_strided_slice %74 {offsets = [3, 0], sizes = [1, 64], strides = [1, 1]} : vector<5x64xf32> to vector<1x64xf32>
    %82 = vector.shape_cast %81 : vector<1x64xf32> to vector<64xf32>
    %83 = vector.extract_strided_slice %74 {offsets = [4, 0], sizes = [1, 64], strides = [1, 1]} : vector<5x64xf32> to vector<1x64xf32>
    %84 = vector.shape_cast %83 : vector<1x64xf32> to vector<64xf32>
    %c0_21 = arith.constant 0 : index
    %c0_22 = arith.constant 0 : index
    %85 = vector.load %arg10[%c0_21, %c0_22] : memref<6x32xf32, #tpu.memory_space<vmem>>, vector<6x32xf32>
    %86 = vector.extract_strided_slice %85 {offsets = [0, 0], sizes = [1, 32], strides = [1, 1]} : vector<6x32xf32> to vector<1x32xf32>
    %87 = vector.shape_cast %86 : vector<1x32xf32> to vector<32xf32>
    %88 = vector.extract_strided_slice %85 {offsets = [1, 0], sizes = [1, 32], strides = [1, 1]} : vector<6x32xf32> to vector<1x32xf32>
    %89 = vector.shape_cast %88 : vector<1x32xf32> to vector<32xf32>
    %90 = vector.extract_strided_slice %85 {offsets = [2, 0], sizes = [1, 32], strides = [1, 1]} : vector<6x32xf32> to vector<1x32xf32>
    %91 = vector.shape_cast %90 : vector<1x32xf32> to vector<32xf32>
    %92 = vector.extract_strided_slice %85 {offsets = [3, 0], sizes = [1, 32], strides = [1, 1]} : vector<6x32xf32> to vector<1x32xf32>
    %93 = vector.shape_cast %92 : vector<1x32xf32> to vector<32xf32>
    %94 = vector.extract_strided_slice %85 {offsets = [4, 0], sizes = [1, 32], strides = [1, 1]} : vector<6x32xf32> to vector<1x32xf32>
    %95 = vector.shape_cast %94 : vector<1x32xf32> to vector<32xf32>
    %96 = vector.extract_strided_slice %85 {offsets = [5, 0], sizes = [1, 32], strides = [1, 1]} : vector<6x32xf32> to vector<1x32xf32>
    %97 = vector.shape_cast %96 : vector<1x32xf32> to vector<32xf32>
    %98 = arith.truncf %73 : vector<16x16xf32> to vector<16x16xbf16>
    %99 = tpu.concatenate %98, %1 in 1 : vector<16x16xbf16>, vector<16x16xbf16> -> vector<16x32xbf16>
    %c0_23 = arith.constant 0 : index
    %c0_24 = arith.constant 0 : index
    %100 = vector.load %arg7[%c0_23, %c0_24] : memref<32x64xbf16, #tpu.memory_space<vmem>>, vector<32x64xbf16>
    %cst_25 = arith.constant dense<0.000000e+00> : vector<16x64xf32>
    %101 = tpu.matmul %99, %100, %cst_25 {dimension_numbers = #tpu.dot_dimension_numbers<[1], [0], [0], [1], [0, 0, 1, 1], [], []>} : vector<16x32xbf16>, vector<32x64xbf16>, vector<16x64xf32> -> vector<16x64xf32>
    %102 = vector.shape_cast %76 : vector<64xf32> to vector<1x64xf32>
    %103 = vector.broadcast %102 : vector<1x64xf32> to vector<16x64xf32>
    %104 = arith.addf %101, %103 : vector<16x64xf32>
    %105 = vector.shape_cast %78 : vector<64xf32> to vector<1x64xf32>
    %106 = vector.broadcast %105 : vector<1x64xf32> to vector<16x64xf32>
    %107 = arith.mulf %104, %106 : vector<16x64xf32>
    %108 = vector.shape_cast %80 : vector<64xf32> to vector<1x64xf32>
    %109 = vector.broadcast %108 : vector<1x64xf32> to vector<16x64xf32>
    %110 = arith.addf %107, %109 : vector<16x64xf32>
    %111 = arith.negf %110 : vector<16x64xf32>
    %112 = math.exp %111 : vector<16x64xf32>
    %cst_26 = arith.constant 1.000000e+00 : f32
    %113 = vector.broadcast %cst_26 : f32 to vector<16x64xf32>
    %114 = arith.addf %113, %112 : vector<16x64xf32>
    %115 = arith.divf %113, %114 : vector<16x64xf32>
    %116 = vector.shape_cast %84 : vector<64xf32> to vector<1x64xf32>
    %117 = vector.broadcast %116 : vector<1x64xf32> to vector<16x64xf32>
    %118 = arith.mulf %115, %117 : vector<16x64xf32>
    %119 = vector.shape_cast %82 : vector<64xf32> to vector<1x64xf32>
    %120 = vector.broadcast %119 : vector<1x64xf32> to vector<16x64xf32>
    %121 = arith.addf %120, %118 : vector<16x64xf32>
    %122 = arith.mulf %104, %121 : vector<16x64xf32>
    %123 = arith.truncf %122 : vector<16x64xf32> to vector<16x64xbf16>
    %c0_27 = arith.constant 0 : index
    %c0_28 = arith.constant 0 : index
    %124 = vector.load %arg9[%c0_27, %c0_28] : memref<64x32xbf16, #tpu.memory_space<vmem>>, vector<64x32xbf16>
    %cst_29 = arith.constant dense<0.000000e+00> : vector<16x32xf32>
    %125 = tpu.matmul %123, %124, %cst_29 {dimension_numbers = #tpu.dot_dimension_numbers<[1], [0], [0], [1], [0, 0, 1, 1], [], []>} : vector<16x64xbf16>, vector<64x32xbf16>, vector<16x32xf32> -> vector<16x32xf32>
    %126 = vector.shape_cast %87 : vector<32xf32> to vector<1x32xf32>
    %127 = vector.broadcast %126 : vector<1x32xf32> to vector<16x32xf32>
    %128 = arith.addf %125, %127 : vector<16x32xf32>
    %129 = vector.shape_cast %89 : vector<32xf32> to vector<1x32xf32>
    %130 = vector.broadcast %129 : vector<1x32xf32> to vector<16x32xf32>
    %131 = arith.mulf %128, %130 : vector<16x32xf32>
    %132 = vector.shape_cast %91 : vector<32xf32> to vector<1x32xf32>
    %133 = vector.broadcast %132 : vector<1x32xf32> to vector<16x32xf32>
    %134 = arith.addf %131, %133 : vector<16x32xf32>
    %135 = arith.negf %134 : vector<16x32xf32>
    %136 = math.exp %135 : vector<16x32xf32>
    %cst_30 = arith.constant 1.000000e+00 : f32
    %137 = vector.broadcast %cst_30 : f32 to vector<16x32xf32>
    %138 = arith.addf %137, %136 : vector<16x32xf32>
    %139 = arith.divf %137, %138 : vector<16x32xf32>
    %140 = vector.shape_cast %95 : vector<32xf32> to vector<1x32xf32>
    %141 = vector.broadcast %140 : vector<1x32xf32> to vector<16x32xf32>
    %142 = arith.mulf %139, %141 : vector<16x32xf32>
    %143 = vector.shape_cast %93 : vector<32xf32> to vector<1x32xf32>
    %144 = vector.broadcast %143 : vector<1x32xf32> to vector<16x32xf32>
    %145 = arith.addf %144, %142 : vector<16x32xf32>
    %146 = arith.mulf %128, %145 : vector<16x32xf32>
    %147 = vector.shape_cast %97 : vector<32xf32> to vector<1x32xf32>
    %148 = vector.broadcast %147 : vector<1x32xf32> to vector<16x32xf32>
    %149 = arith.mulf %146, %148 : vector<16x32xf32>
    %cst_31 = arith.constant dense<0.000000e+00> : vector<16xf32>
    %150 = vector.multi_reduction <add>, %149, %cst_31 [1] : vector<16x32xf32> to vector<16xf32>
    %151 = vector.shape_cast %150 : vector<16xf32> to vector<1x1x16xf32>
    %c0_32 = arith.constant 0 : index
    %c0_33 = arith.constant 0 : index
    %c0_34 = arith.constant 0 : index
    %152 = vector.load %arg11[%c0_32, %c0_33, %c0_34] : memref<1x1x16xf32, #tpu.memory_space<vmem>>, vector<1x1x16xf32>
    tpu.vector_store %arg11[%c0_32, %c0_33, %c0_34], %151 {strides = array<i32>} : memref<1x1x16xf32, #tpu.memory_space<vmem>>, vector<1x1x16xf32>,
    return
  }
  func.func @transform_0(%arg0: i32) -> (i32, i32) {
    %c0_i32 = arith.constant 0 : i32
    %c0_i32_0 = arith.constant 0 : i32
    return %arg0, %c0_i32 : i32, i32
  }
  func.func @transform_1(%arg0: i32) -> (i32, i32, i32) {
    %c0_i32 = arith.constant 0 : i32
    %c0_i32_0 = arith.constant 0 : i32
    %c0_i32_1 = arith.constant 0 : i32
    return %arg0, %c0_i32, %c0_i32_0 : i32, i32, i32
  }
  func.func @transform_2(%arg0: i32) -> (i32, i32) {
    %c0_i32 = arith.constant 0 : i32
    %c0_i32_0 = arith.constant 0 : i32
    return %arg0, %c0_i32 : i32, i32
  }
  func.func @transform_3(%arg0: i32) -> (i32, i32) {
    %c0_i32 = arith.constant 0 : i32
    %c0_i32_0 = arith.constant 0 : i32
    %c0_i32_1 = arith.constant 0 : i32
    return %c0_i32, %c0_i32_0 : i32, i32
  }
  func.func @transform_4(%arg0: i32) -> (i32, i32) {
    %c0_i32 = arith.constant 0 : i32
    %c0_i32_0 = arith.constant 0 : i32
    %c0_i32_1 = arith.constant 0 : i32
    return %c0_i32, %c0_i32_0 : i32, i32
  }
  func.func @transform_5(%arg0: i32) -> (i32, i32) {
    %c0_i32 = arith.constant 0 : i32
    %c0_i32_0 = arith.constant 0 : i32
    %c0_i32_1 = arith.constant 0 : i32
    return %c0_i32, %c0_i32_0 : i32, i32
  }
  func.func @transform_6(%arg0: i32) -> (i32, i32) {
    %c0_i32 = arith.constant 0 : i32
    %c0_i32_0 = arith.constant 0 : i32
    %c0_i32_1 = arith.constant 0 : i32
    return %c0_i32, %c0_i32_0 : i32, i32
  }
  func.func @transform_7(%arg0: i32) -> (i32, i32) {
    %c0_i32 = arith.constant 0 : i32
    %c0_i32_0 = arith.constant 0 : i32
    %c0_i32_1 = arith.constant 0 : i32
    return %c0_i32, %c0_i32_0 : i32, i32
  }
  func.func @transform_8(%arg0: i32) -> (i32, i32) {
    %c0_i32 = arith.constant 0 : i32
    %c0_i32_0 = arith.constant 0 : i32
    %c0_i32_1 = arith.constant 0 : i32
    return %c0_i32, %c0_i32_0 : i32, i32
  }
  func.func @transform_9(%arg0: i32) -> (i32, i32) {
    %c0_i32 = arith.constant 0 : i32
    %c0_i32_0 = arith.constant 0 : i32
    %c0_i32_1 = arith.constant 0 : i32
    return %c0_i32, %c0_i32_0 : i32, i32
  }
  func.func @transform_10(%arg0: i32) -> (i32, i32, i32) {
    %c0_i32 = arith.constant 0 : i32
    %c0_i32_0 = arith.constant 0 : i32
    %c0_i32_1 = arith.constant 0 : i32
    return %arg0, %c0_i32, %c0_i32_0 : i32, i32, i32
  }
}

</mosaic_0001>

<bundles_post_ra>
// kernel: split.3
= control target key start
LH: loop header
LB: loop body
LE: loop exit
PB: predicated region body
PF: predicated region fallthrough
CT: control target
= control target key end

     0   :  { %v3_v0 = vlaneseq  ;;  %v67_v15 = vmov 0.0   ;;  %s102_s0 = inlined_call_operand.vmem [shape: f32[64,32], index: 0, kind: input, shape index: {}]   ;;  %s103_s1 = inlined_call_operand.vmem [shape: bf16[16,32], index: 1, kind: output, shape index: {}]  }
   0x1   :  { %v2_v1 = vld [vmem:[%s102_s0] sm:$0xff]  ;;  %v48_v3 = vld [vmem:[%s102_s0 + $0x8] sm:$0xff]  ;;  %v50_v4 = vld [vmem:[%s102_s0 + $0x10] sm:$0xff] }
   0x2   :  { %v4_v2 = vand.u32 127, %v3_v0  ;;  %v52_v5 = vld [vmem:[%s102_s0 + $0x18] sm:$0xff]  ;;  %s66_s0 = smov 80  }
   0x4   :  { %vm5_vm0 = vcmp.lt.s32.totalorder %v4_v2, 48 }
   0x5   :  { %v6_v6 = vsel %vm5_vm0, 0, %v2_v1  ;;  %v17_v7 = vsel %vm5_vm0, 0, %v48_v3  ;;  %v29_v8 = vsel %vm5_vm0, 0, %v50_v4  ;;  %v41_v9 = vsel %vm5_vm0, 0, %v52_v5 }
   0x6   :  { %v56_v10 = vpack.i.bf16 %v17_v7, %v6_v6  ;;  %v61_v11 = vpack.i.bf16 %v41_v9, %v29_v8 }
   0x8   :  { %57 = vrot.lane.b32.xlu0 %v56_v10, %s66_s0 }
   0xc   :  { %62 = vrot.lane.b32.xlu0 %v61_v11, %s66_s0 }
  0x7a   :  { %v58_v12 = vpop.permute.xlu0 %57 }
  0x7b   :  { %v60_v13 = vunpack.i.h.bf16 %v58_v12  ;;  %v59_v14 = vunpack.i.l.bf16 %v58_v12 }
  0x7d   :  { %v22_v16 = vpack.c.bf16 %v67_v15, %v60_v13  ;;  %v10_v17 = vpack.c.bf16 %v67_v15, %v59_v14 }
  0x7e   :  { %v63_v18 = vpop.permute.xlu0 %62 }
  0x7f   :  { %49 = vst [vmem:[%s103_s1 + $0x4] sm:$0xf] %v22_v16  ;;  %11 = vst [vmem:[%s103_s1] sm:$0xf] %v10_v17  ;;  %v65_v19 = vunpack.i.h.bf16 %v63_v18  ;;  %v64_v20 = vunpack.i.l.bf16 %v63_v18 }
  0x81   :  { %v46_v21 = vpack.c.bf16 %v67_v15, %v65_v19  ;;  %v34_v22 = vpack.c.bf16 %v67_v15, %v64_v20 }
  0x83   :  { %53 = vst [vmem:[%s103_s1 + $0xc] sm:$0xf] %v46_v21  ;;  %51 = vst [vmem:[%s103_s1 + $0x8] sm:$0xf] %v34_v22 }

// kernel: din_dice_whole_forward.1
= control target key start
LH: loop header
LB: loop body
LE: loop exit
PB: predicated region body
PF: predicated region fallthrough
CT: control target
= control target key end

     0   :  { %s3581_s13 = smov 0   ;;  %s4870_s0 = inlined_call_operand.vmem [shape: s32[32,1], index: 0, kind: input, shape index: {}]   ;;  %s4871_s1 = inlined_call_operand.vmem [shape: bf16[32,16,16], index: 1, kind: input, shape index: {}]   ;;  %s4872_s2 = inlined_call_operand.vmem [shape: bf16[32,16], index: 2, kind: input, shape index: {}]   ;;  %s4873_s3 = inlined_call_operand.vmem [shape: bf16[32,32], index: 3, kind: input, shape index: {}]   ;;  %s4874_s4 = inlined_call_operand.vmem [shape: bf16[16,32], index: 4, kind: input, shape index: {}]   ;;  %s4875_s5 = inlined_call_operand.vmem [shape: f32[6,32], index: 5, kind: input, shape index: {}]   ;;  %s4876_s6 = inlined_call_operand.vmem [shape: bf16[32,64], index: 6, kind: input, shape index: {}]   ;;  %s4877_s7 = inlined_call_operand.vmem [shape: f32[5,64], index: 7, kind: input, shape index: {}]   ;;  %s4878_s8 = inlined_call_operand.vmem [shape: bf16[64,32], index: 8, kind: input, shape index: {}]   ;;  %s4879_s9 = inlined_call_operand.vmem [shape: f32[6,32], index: 9, kind: input, shape index: {}]   ;;  %s4880_s10 = inlined_call_operand.vmem [shape: f32[2,1,16], index: 10, kind: output, shape index: {}]  }
   0x1 LB: > { %s3587_s14 = sadd.s32 4294967295, %s3519_s13   ;;  %p3062_p0 = scmp.ge.s32.totalorder %s3519_s13, 1  ;;  %s3519_s13 = sphi %s3581_s13, %s20_s13  }
   0x2   : > { %p336_p1 = scmp.lt.s32.totalorder %s3519_s13, 3 }
   0x4   : > { %p337_p2 = pnand %p3062_p0, %p336_p1 }
   0x6   : > { %340 = sbr.rel (%p337_p2) target bundleno = 1826 (0x722), region = 60 }
   0xb   : > { %s3063_s15 = sshll.u32 %s3587_s14, 1  ;;  %v4883_v0 = vlaneseq  ;;  %s3065_s16 = sshll.u32 %s3587_s14, 4  ;;  %v3521_v1 = vmov 1966171168   ;;  %v3303_v4 = vld [vmem:[%s4873_s3 + $0x8] sm:$0xff]   ;;  %v3304_v45 = vld [vmem:[%s4873_s3] sm:$0xff]  }
   0xc   : > { %p384_p3 = scmp.lt.s32.totalorder %s3063_s15, 3  ;;  %v443_v2 = vunpack.c.l.s4 %v3521_v1  ;;  %p390_p4 = scmp.lt.s32.totalorder %s3065_s16, 31  ;;  %3222 = vmatprep.subr.bf16.mxu0 %v3303_v4  ;;  %3284 = vmatprep.subr.bf16.mxu1 %v3303_v4  ;;  %vm986_vm0 = vcmask 130048   ;;  %vm1051_vm1 = vcmask 261120   ;;  %vm3524_vm2 = vmmov 0  }
   0xd   : > { %v3594_v3 = vshrl.u32 %v4883_v0, 7  ;;  %3223 = vmatpush3.bf16.msra.mxu0 %v3303_v4  ;;  %3286 = vmatpush3.bf16.msra.mxu1 %v3303_v4  ;;  %s3522_s29 = smov 16   ;;  %vm2102_vm3 = vcmask 130112   ;;  %vm2239_vm4 = vcmask 1041409   ;;  %vm2241_vm5 = vcmask 1042434   ;;  %p402_p5 = scmp.lt.s32.totalorder %s3587_s14, 1 }
   0xe   : > { %s4933_s15 = smov (!%p384_p3, %s3063_s15), 3  ;;  %v444_v5 = vunpack.c.0.s8 %v443_v2  ;;  %s4935_s16 = smov (!%p390_p4, %s3065_s16), 31  ;;  %3224 = vmatprep.subr.bf16.mxu0 %v3304_v45  ;;  %3285 = vmatprep.subr.bf16.mxu1 %v3304_v45  ;;  %vm2243_vm6 = vcmask 1043459   ;;  %vm2245_vm7 = vcmask 1044484   ;;  %vm2247_vm8 = vcmask 1045509  }
   0xf   : > { %4902 = vst [vmem:[#allocation2_spill] sm:$0xff] %v3594_v3  ;;  %s3069_s19 = sshll.u32 %s4933_s15, 2  ;;  %v3617_v11 = vsub.s32 0, %v3594_v3  ;;  %s3193_s23 = sshll.u32 %s4935_s16, 3  ;;  %vm2249_vm9 = vcmask 1046534   ;;  %vm2251_vm10 = vcmask 1047559  }
  0x10   : > { %v3603_v6 = vsub.s32 %v444_v5, %v3594_v3  ;;  %s400_s22 = scalar_lea.vmem %s4872_s2, %s3069_s19  ;;  %s3640_s26 = scalar_lea.vmem %s4871_s1, %s3193_s23  ;;  %vm2878_vm13 = vcmask 523264   ;;  %vm2985_vm14 = vcmask 122880  }
  0x11   : > { %v3608_v7 = vld [vmem:[%s400_s22] sm:$0xf]  ;;  %v3610_v8 = vld [vmem:[%s400_s22 + $0x4] sm:$0xf]  ;;  %v3658_v46 = vld [vmem:[%s3640_s26 + $0x10] sm:$0xf]  ;;  %3225 = vmatpush3.bf16.msra.mxu0 %v3304_v45  ;;  %3287 = vmatpush3.bf16.msra.mxu1 %v3304_v45 }
  0x12   : > { %v448_v9 = vrot.slane %v3608_v7, %v3603_v6  ;;  %v472_v10 = vrot.slane %v3610_v8, %v3603_v6  ;;  %v3647_v39 = vld [vmem:[%s3640_s26] sm:$0xf]  ;;  %v3650_v40 = vld [vmem:[%s3640_s26 + $0x4] sm:$0xf]  ;;  %v3661_v47 = vld [vmem:[%s3640_s26 + $0x14] sm:$0xf] }
  0x13   : > { %v3664_v48 = vld [vmem:[%s3640_s26 + $0x8] sm:$0xf]  ;;  %v3675_v1 = vld [vmem:[%s3640_s26 + $0xc] sm:$0xf]  ;;  %v3678_v4 = vld [vmem:[%s3640_s26 + $0x20] sm:$0xf] }
  0x14   : > { %v456_v12 = vrot.slane %v448_v9, %v3603_v6  ;;  %v449_v13 = vcombine.high %v448_v9, %v448_v9  ;;  %v3621_v14 = vrot.slane %v472_v10, %v3603_v6  ;;  %v473_v15 = vcombine.high %v472_v10, %v472_v10  ;;  %v3681_v5 = vld [vmem:[%s3640_s26 + $0x24] sm:$0xf]  ;;  %s3064_s17 = sshll.u32 %s4933_s15, 3  ;;  %s4937_s14 = smov (!%p402_p5, %s3587_s14), 1 }
  0x15   : > { %s387_s20 = scalar_lea.vmem %s4870_s0, %s3064_s17  ;;  %s404_s15 = scalar_lea.vmem %s4880_s10, %s4937_s14 }
  0x16   : > { %v3070_v16 = vpack.i.b16 %v456_v12, %v456_v12  ;;  %v3624_v17 = vrot.slane %v449_v13, %v3603_v6  ;;  %v491_v18 = vunpack.i.h.s16 %v456_v12  ;;  %v464_v19 = vcombine.high %v456_v12, %v456_v12  ;;  %v3686_v13 = vld [vmem:[%s3640_s26 + $0x60] sm:$0xf] }
  0x17   : > { %v488_v20 = vcombine.high %v3621_v14, %v3621_v14  ;;  %v3629_v21 = vrot.slane %v473_v15, %v3603_v6  ;;  %v3074_v22 = vpack.i.b16 %v3621_v14, %v3621_v14 }
  0x18   : > { %v525_v23 = vrot.slane %v3070_v16, %v3617_v11  ;;  %v3071_v24 = vpack.i.b16 %v3624_v17, %v3624_v17  ;;  %v507_v25 = vpack.i.b16 %v491_v18, %v491_v18  ;;  %v493_v26 = vunpack.i.h.s16 %v3624_v17 }
  0x19   : > { %v3072_v27 = vpack.i.b16 %v464_v19, %v464_v19  ;;  %v495_v28 = vunpack.i.h.s16 %v464_v19  ;;  %v3076_v29 = vpack.i.b16 %v488_v20, %v488_v20  ;;  %v503_v30 = vunpack.i.h.s16 %v488_v20 }
  0x1a   : > { %v587_v31 = vpack.i.b16 %v525_v23, %v525_v23  ;;  %v533_v32 = vrot.slane %v3071_v24, %v3617_v11  ;;  %v529_v33 = vrot.slane %v507_v25, %v3617_v11  ;;  %v509_v34 = vpack.i.b16 %v493_v26, %v493_v26  ;;  %v3692_v23 = vld [vmem:[%s3640_s26 + $0x18] sm:$0xf]  ;;  %v3695_v24 = vld [vmem:[%s3640_s26 + $0x1c] sm:$0xf]  ;;  %v3698_v25 = vld [vmem:[%s3640_s26 + $0x64] sm:$0xf] }
  0x1b   : > { %v541_v35 = vrot.slane %v3072_v27, %v3617_v11  ;;  %v511_v36 = vpack.i.b16 %v495_v28, %v495_v28  ;;  %v573_v37 = vrot.slane %v3076_v29, %v3617_v11  ;;  %v519_v38 = vpack.i.b16 %v503_v30, %v503_v30  ;;  %v3704_v30 = vld [vmem:[%s3640_s26 + $0x28] sm:$0xf] }
  0x1c   : > { %v592_v41 = vrot.slane %v587_v31, %v3617_v11  ;;  %v601_v42 = vpack.i.b16 %v533_v32, %v533_v32  ;;  %v594_v43 = vpack.i.b16 %v529_v33, %v529_v33  ;;  %v537_v44 = vrot.slane %v509_v34, %v3617_v11  ;;  %v3707_v31 = vld [vmem:[%s3640_s26 + $0x2c] sm:$0xf] }
  0x1d   : > { %v615_v49 = vpack.i.b16 %v541_v35, %v541_v35  ;;  %v545_v50 = vrot.slane %v511_v36, %v3617_v11  ;;  %v671_v51 = vpack.i.b16 %v573_v37, %v573_v37  ;;  %v577_v52 = vrot.slane %v519_v38, %v3617_v11 }
  0x1e   : > { %v3078_v53 = vcombine.low %v592_v41, %v592_v41  ;;  %v606_v54 = vrot.slane %v601_v42, %v3617_v11  ;;  %v599_v55 = vrot.slane %v594_v43, %v3617_v11  ;;  %v608_v56 = vpack.i.b16 %v537_v44, %v537_v44 }
  0x1f   : > { %v620_v57 = vrot.slane %v615_v49, %v3617_v11  ;;  %v622_v58 = vpack.i.b16 %v545_v50, %v545_v50  ;;  %v676_v59 = vrot.slane %v671_v51, %v3617_v11  ;;  %v678_v60 = vpack.i.b16 %v577_v52, %v577_v52  ;;  %v3720_v50 = vld [vmem:[%s3640_s26 + $0x68] sm:$0xf]  ;;  %v3723_v51 = vld [vmem:[%s3640_s26 + $0x6c] sm:$0xf] }
  0x20   : > { %v762_v61 = vmul.bf16 %v3078_v53, %v3647_v39  ;;  %v763_v62 = vmul.bf16 %v3078_v53, %v3650_v40  ;;  %v3080_v63 = vcombine.low %v606_v54, %v606_v54  ;;  %v3079_v2 = vcombine.low %v599_v55, %v599_v55 }
  0x21   : > { %v613_v9 = vrot.slane %v608_v56, %v3617_v11  ;;  %v3082_v10 = vcombine.low %v620_v57, %v620_v57  ;;  %v627_v12 = vrot.slane %v622_v58, %v3617_v11  ;;  %v3090_v15 = vcombine.low %v676_v59, %v676_v59 }
  0x22   : > { %v3110_v16 = vcombine.low %v762_v61, %v763_v62  ;;  %v766_v18 = vmul.bf16 %v3080_v63, %v3658_v46  ;;  %v767_v19 = vmul.bf16 %v3080_v63, %v3661_v47  ;;  %v764_v20 = vmul.bf16 %v3079_v2, %v3664_v48 }
  0x23   : > { %v765_v26 = vmul.bf16 %v3079_v2, %v3675_v1  ;;  %v3081_v27 = vcombine.low %v613_v9, %v613_v9  ;;  %v770_v28 = vmul.bf16 %v3082_v10, %v3678_v4  ;;  %v771_v29 = vmul.bf16 %v3082_v10, %v3681_v5 }
  0x24   : > { %954 = vrot.lane.b32.xlu0 %v3110_v16, %s3522_s29  ;;  %v3112_v32 = vcombine.low %v766_v18, %v767_v19  ;;  %v3083_v33 = vcombine.low %v627_v12, %v627_v12  ;;  %v786_v34 = vmul.bf16 %v3090_v15, %v3686_v13  ;;  %v499_v35 = vunpack.i.h.s16 %v3621_v14 }
  0x25   : > { %v3111_v36 = vcombine.low %v764_v20, %v765_v26  ;;  %v768_v37 = vmul.bf16 %v3081_v27, %v3692_v23  ;;  %v769_v38 = vmul.bf16 %v3081_v27, %v3695_v24  ;;  %v787_v41 = vmul.bf16 %v3090_v15, %v3698_v25 }
  0x26   : > { %958 = vrot.lane.b32.xlu1 %v3112_v32, %s3522_s29  ;;  %v3114_v42 = vcombine.low %v770_v28, %v771_v29  ;;  %v772_v43 = vmul.bf16 %v3083_v33, %v3704_v30  ;;  %v773_v44 = vmul.bf16 %v3083_v33, %v3707_v31  ;;  %v683_v45 = vrot.slane %v678_v60, %v3617_v11 }
  0x27   : > { %v3113_v49 = vcombine.low %v768_v37, %v769_v38  ;;  %v465_v52 = vcombine.high %v3624_v17, %v3624_v17  ;;  %v489_v53 = vcombine.high %v3629_v21, %v3629_v21  ;;  %v557_v54 = vrot.slane %v3074_v22, %v3617_v11  ;;  %v3752_v37 = vld [vmem:[%s3640_s26 + $0x30] sm:$0xf]  ;;  %v3755_v38 = vld [vmem:[%s3640_s26 + $0x34] sm:$0xf] }
  0x28   : > { %956 = vrot.lane.b32.xlu0 %v3111_v36, %s3522_s29  ;;  %v3115_v55 = vcombine.low %v772_v43, %v773_v44  ;;  %v3091_v56 = vcombine.low %v683_v45, %v683_v45  ;;  %v515_v57 = vpack.i.b16 %v499_v35, %v499_v35  ;;  %v3075_v58 = vpack.i.b16 %v3629_v21, %v3629_v21  ;;  %v3763_v45 = vld [vmem:[%s3640_s26 + $0x74] sm:$0xf] }
  0x29   : > { %v3073_v59 = vpack.i.b16 %v465_v52, %v465_v52  ;;  %v497_v60 = vunpack.i.h.s16 %v465_v52  ;;  %v3077_v61 = vpack.i.b16 %v489_v53, %v489_v53  ;;  %v505_v17 = vunpack.i.h.s16 %v489_v53  ;;  %v3768_v53 = vld [vmem:[%s3640_s26 + $0x38] sm:$0xf] }
  0x2a   : > { %960 = vrot.lane.b32.xlu1 %v3113_v49, %s3522_s29  ;;  %v788_v62 = vmul.bf16 %v3091_v56, %v3720_v50  ;;  %v789_v63 = vmul.bf16 %v3091_v56, %v3723_v51  ;;  %v643_v14 = vpack.i.b16 %v557_v54, %v557_v54  ;;  %v561_v22 = vrot.slane %v515_v57, %v3617_v11  ;;  %v3771_v54 = vld [vmem:[%s3640_s26 + $0x3c] sm:$0xf] }
  0x2b   : > { %v549_v2 = vrot.slane %v3073_v59, %v3617_v11  ;;  %v513_v9 = vpack.i.b16 %v497_v60, %v497_v60  ;;  %v581_v10 = vrot.slane %v3077_v61, %v3617_v11  ;;  %v521_v12 = vpack.i.b16 %v505_v17, %v505_v17  ;;  %v3779_v17 = vld [vmem:[%s3640_s26 + $0x78] sm:$0xf] }
  0x2c   : > { %962 = vrot.lane.b32.xlu0 %v3114_v42, %s3522_s29  ;;  %v3122_v15 = vcombine.low %v786_v34, %v787_v41  ;;  %v650_v16 = vpack.i.b16 %v561_v22, %v561_v22  ;;  %v565_v18 = vrot.slane %v3075_v58, %v3617_v11  ;;  %v3123_v28 = vcombine.low %v788_v62, %v789_v63  ;;  %v3758_v41 = vld [vmem:[%s3640_s26 + $0x70] sm:$0xf]  ;;  %v3782_v62 = vld [vmem:[%s3640_s26 + $0x7c] sm:$0xf]  ;;  %v3785_v63 = vld [vmem:[%s3640_s26 + $0x40] sm:$0xf] }
  0x2d   : > { %v629_v19 = vpack.i.b16 %v549_v2, %v549_v2  ;;  %v553_v20 = vrot.slane %v513_v9, %v3617_v11  ;;  %v685_v26 = vpack.i.b16 %v581_v10, %v581_v10  ;;  %v585_v27 = vrot.slane %v521_v12, %v3617_v11  ;;  %v3789_v2 = vld [vmem:[%s3640_s26 + $0x44] sm:$0xf] }
  0x2e   : > { %964 = vrot.lane.b32.xlu1 %v3115_v55, %s3522_s29  ;;  %v648_v29 = vrot.slane %v643_v14, %v3617_v11  ;;  %v657_v32 = vpack.i.b16 %v565_v18, %v565_v18  ;;  %v655_v42 = vrot.slane %v650_v16, %v3617_v11  ;;  %v501_v57 = vunpack.i.h.s16 %v3629_v21 }
  0x2f   : > { %v634_v33 = vrot.slane %v629_v19, %v3617_v11  ;;  %v636_v34 = vpack.i.b16 %v553_v20, %v553_v20  ;;  %v690_v35 = vrot.slane %v685_v26, %v3617_v11  ;;  %v692_v36 = vpack.i.b16 %v585_v27, %v585_v27  ;;  %v3797_v19 = vld [vmem:[%s3640_s26 + $0x48] sm:$0xf]  ;;  %v3800_v20 = vld [vmem:[%s3640_s26 + $0x4c] sm:$0xf] }
  0x30   : > { %978 = vrot.lane.b32.xlu0 %v3122_v15, %s3522_s29  ;;  %v3086_v55 = vcombine.low %v648_v29, %v648_v29  ;;  %v662_v56 = vrot.slane %v657_v32, %v3617_v11  ;;  %v3087_v12 = vcombine.low %v655_v42, %v655_v42  ;;  %v517_v26 = vpack.i.b16 %v501_v57, %v501_v57 }
  0x31   : > { %v3084_v43 = vcombine.low %v634_v33, %v634_v33  ;;  %v641_v44 = vrot.slane %v636_v34, %v3617_v11  ;;  %v3092_v49 = vcombine.low %v690_v35, %v690_v35  ;;  %v697_v52 = vrot.slane %v692_v36, %v3617_v11  ;;  %v3805_v33 = vld [vmem:[%s3640_s26 + $0x50] sm:$0xf]  ;;  %v3808_v34 = vld [vmem:[%s3640_s26 + $0x54] sm:$0xf] }
  0x32   : > { %980 = vrot.lane.b32.xlu1 %v3123_v28, %s3522_s29  ;;  %v778_v18 = vmul.bf16 %v3086_v55, %v3785_v63  ;;  %v779_v29 = vmul.bf16 %v3086_v55, %v3789_v2  ;;  %v3088_v32 = vcombine.low %v662_v56, %v662_v56  ;;  %v569_v35 = vrot.slane %v517_v26, %v3617_v11 }
  0x33   : > { %v774_v58 = vmul.bf16 %v3084_v43, %v3752_v37  ;;  %v775_v59 = vmul.bf16 %v3084_v43, %v3755_v38  ;;  %v3085_v60 = vcombine.low %v641_v44, %v641_v44  ;;  %v790_v61 = vmul.bf16 %v3092_v49, %v3758_v41 }
  0x34   : > { %v791_v14 = vmul.bf16 %v3092_v49, %v3763_v45  ;;  %v3093_v22 = vcombine.low %v697_v52, %v697_v52  ;;  %v780_v42 = vmul.bf16 %v3087_v12, %v3797_v19  ;;  %v781_v43 = vmul.bf16 %v3087_v12, %v3800_v20 }
  0x35   : > { %v3116_v21 = vcombine.low %v774_v58, %v775_v59  ;;  %v776_v9 = vmul.bf16 %v3085_v60, %v3768_v53  ;;  %v777_v10 = vmul.bf16 %v3085_v60, %v3771_v54  ;;  %v664_v44 = vpack.i.b16 %v569_v35, %v569_v35  ;;  %v3825_v60 = vld [vmem:[%s3640_s26 + $0x58] sm:$0xf] }
  0x36   : > { %v792_v15 = vmul.bf16 %v3093_v22, %v3779_v17  ;;  %v793_v16 = vmul.bf16 %v3093_v22, %v3782_v62  ;;  %v3124_v28 = vcombine.low %v790_v61, %v791_v14  ;;  %v3118_v49 = vcombine.low %v778_v18, %v779_v29  ;;  %v3828_v61 = vld [vmem:[%s3640_s26 + $0x5c] sm:$0xf] }
  0x37   : > { %966 = vrot.lane.b32.xlu0 %v3116_v21, %s3522_s29  ;;  %v3117_v27 = vcombine.low %v776_v9, %v777_v10  ;;  %v782_v52 = vmul.bf16 %v3088_v32, %v3805_v33  ;;  %v783_v55 = vmul.bf16 %v3088_v32, %v3808_v34  ;;  %v4881_v56 = vmov 0.0  }
  0x38   : > { %v3125_v36 = vcombine.low %v792_v15, %v793_v16  ;;  %3258 = vmatprep.subr.bf16.mxu1 %v4881_v56  ;;  %v669_v57 = vrot.slane %v664_v44, %v3617_v11  ;;  %v3821_v58 = vcombine.low %v3608_v7, %v3610_v8  ;;  %v3119_v59 = vcombine.low %v780_v42, %v781_v43  ;;  %v3313_v42 = vld [vmem:[%s4874_s4] sm:$0xff]  }
  0x39   : > { %968 = vrot.lane.b32.xlu1 %v3117_v27, %s3522_s29  ;;  %v3120_v22 = vcombine.low %v782_v52, %v783_v55  ;;  %v3094_v7 = vcombine.low %v3647_v39, %v3650_v40  ;;  %v3095_v15 = vcombine.low %v3664_v48, %v3675_v1  ;;  %v3096_v16 = vcombine.low %v3658_v46, %v3661_v47 }
  0x3a   : > { %4903 = vst [vmem:[#allocation3_spill] sm:$0xff] %v3821_v58  ;;  %v3089_v14 = vcombine.low %v669_v57, %v669_v57  ;;  %v3097_v48 = vcombine.low %v3692_v23, %v3695_v24  ;;  %v3106_v46 = vcombine.low %v3686_v13, %v3698_v25  ;;  %v3098_v47 = vcombine.low %v3678_v4, %v3681_v5 }
  0x3b   : > { %982 = vrot.lane.b32.xlu0 %v3124_v28, %s3522_s29  ;;  %v3107_v29 = vcombine.low %v3720_v50, %v3723_v51  ;;  %v3099_v5 = vcombine.low %v3704_v30, %v3707_v31  ;;  %v3100_v24 = vcombine.low %v3752_v37, %v3755_v38  ;;  %v3108_v50 = vcombine.low %v3758_v41, %v3763_v45 }
  0x3c   : > { %v784_v21 = vmul.bf16 %v3089_v14, %v3825_v60  ;;  %v785_v9 = vmul.bf16 %v3089_v14, %v3828_v61  ;;  %v3109_v30 = vcombine.low %v3779_v17, %v3782_v62  ;;  %v3102_v38 = vcombine.low %v3785_v63, %v3789_v2 }
  0x3d   : > { %984 = vrot.lane.b32.xlu1 %v3125_v36, %s3522_s29  ;;  %v3101_v41 = vcombine.low %v3768_v53, %v3771_v54  ;;  %v3103_v53 = vcombine.low %v3797_v19, %v3800_v20  ;;  %v3104_v63 = vcombine.low %v3805_v33, %v3808_v34  ;;  %v3105_v19 = vcombine.low %v3825_v60, %v3828_v61 }
  0x3e   : > { %v3121_v10 = vcombine.low %v784_v21, %v785_v9 }
  0x3f   : > { %970 = vrot.lane.b32.xlu0 %v3118_v49, %s3522_s29 }
  0x41   : > { %972 = vrot.lane.b32.xlu1 %v3119_v59, %s3522_s29 }
  0x43   : > { %974 = vrot.lane.b32.xlu0 %v3120_v22, %s3522_s29 }
  0x45   : > { %976 = vrot.lane.b32.xlu1 %v3121_v10, %s3522_s29 }
  0x96   : > { %v955_v8 = vpop.permute.xlu0 %954 }
  0x97   : > { %v989_v12 = vsel %vm986_vm0, %v3094_v7, %v955_v8 }
  0x98   : > { %v959_v18 = vpop.permute.xlu1 %958  ;;  %3226 = vmatprep.mubr.msk.bf16.mxu0 %vm1051_vm1, %v989_v12 }
  0x99   : > { %v995_v28 = vsel %vm986_vm0, %v3096_v16, %v959_v18 }
  0x9a   : > { %v957_v26 = vpop.permute.xlu0 %956 }
  0x9b   : > { %v992_v27 = vsel %vm986_vm0, %v3095_v15, %v957_v26 }
  0x9c   : > { %3227 = vmatmul.mubr.msk.bf16.vlgmr.msra.gmra.mxu0 %vm1051_vm1, %v992_v27  ;;  %v961_v39 = vpop.permute.xlu1 %960 }
  0x9d   : > { %3230 = vmatprep.mubr.msk.bf16.mxu0 %vm1051_vm1, %v995_v28  ;;  %v998_v35 = vsel %vm986_vm0, %v3097_v48, %v961_v39 }
  0x9e   : > { %v963_v40 = vpop.permute.xlu0 %962 }
  0x9f   : > { %v1001_v23 = vsel %vm986_vm0, %v3098_v47, %v963_v40 }
  0xa0   : > { %v965_v1 = vpop.permute.xlu1 %964 }
  0xa1   : > { %v1004_v51 = vsel %vm986_vm0, %v3099_v5, %v965_v1 }
  0xa2   : > { %v979_v32 = vpop.permute.xlu0 %978 }
  0xa3   : > { %v1025_v36 = vsel %vm986_vm0, %v3106_v46, %v979_v32 }
  0xa4   : > { %3231 = vmatmul.mubr.msk.bf16.gmra.mxu0 %vm1051_vm1, %v998_v35  ;;  %v981_v13 = vpop.permute.xlu1 %980  ;;  %3250 = vmatprep.mubr.msk.bf16.mxu1 %vm1051_vm1, %v1025_v36 }
  0xa5   : > { %v1028_v4 = vsel %vm986_vm0, %v3107_v29, %v981_v13  ;;  %3234 = vmatprep.mubr.msk.bf16.mxu0 %vm1051_vm1, %v1001_v23 }
  0xa6   : > { %3251 = vmatmul.mubr.msk.bf16.vlgmr.msra.gmra.mxu1 %vm1051_vm1, %v1028_v4 }
  0xa7   : > { %3259 = vmatpush3.bf16.msra.mxu1 %v3313_v42 }
  0xa8   : > { %3264 = vmatprep.subr.bf16.mxu1 %v4881_v56 }
  0xa9   : > { %v967_v25 = vpop.permute.xlu0 %966 }
  0xaa   : > { %v1007_v44 = vsel %vm986_vm0, %v3100_v24, %v967_v25 }
  0xab   : > { %v969_v43 = vpop.permute.xlu1 %968 }
  0xac   : > { %3235 = vmatmul.mubr.msk.bf16.gmra.mxu0 %vm1051_vm1, %v1004_v51  ;;  %v1010_v62 = vsel %vm986_vm0, %v3101_v41, %v969_v43 }
  0xad   : > { %v983_v31 = vpop.permute.xlu0 %982  ;;  %3238 = vmatprep.mubr.msk.bf16.mxu0 %vm1051_vm1, %v1007_v44 }
  0xae   : > { %v1031_v37 = vsel %vm986_vm0, %v3108_v50, %v983_v31  ;;  %v3972_v31 = vld [vmem:[%s4875_s5] sm:$0x3f] }
  0xaf   : > { %v985_v45 = vpop.permute.xlu1 %984  ;;  %3254 = vmatprep.mubr.msk.bf16.mxu1 %vm1051_vm1, %v1031_v37 }
  0xb0   : > { %v1034_v49 = vsel %vm986_vm0, %v3109_v30, %v985_v45  ;;  %v3976_v45 = vsub.s32 1, %v3594_v3 }
  0xb1   : > { %3255 = vmatmul.mubr.msk.bf16.gmra.mxu1 %vm1051_vm1, %v1034_v49  ;;  %v971_v52 = vpop.permute.xlu0 %970  ;;  %v3979_v49 = vsub.s32 2, %v3594_v3 }
  0xb2   : > { %3260 = vmatprep.mubr.msk.bf16.mxu1 %vm3524_vm2, %v4881_v56  ;;  %v1013_v17 = vsel %vm986_vm0, %v3102_v38, %v971_v52  ;;  %4904 = vst [vmem:[#allocation4_spill] sm:$0xff] %v3976_v45 }
  0xb3   : > { %v973_v54 = vpop.permute.xlu1 %972  ;;  %4905 = vst [vmem:[#allocation5_spill] sm:$0xff] %v3979_v49 }
  0xb4   : > { %3239 = vmatmul.mubr.msk.bf16.gmra.mxu0 %vm1051_vm1, %v1010_v62  ;;  %v1016_v55 = vsel %vm986_vm0, %v3103_v53, %v973_v54 }
  0xb5   : > { %3242 = vmatprep.mubr.msk.bf16.mxu0 %vm1051_vm1, %v1013_v17  ;;  %v975_v2 = vpop.permute.xlu0 %974 }
  0xb6   : > { %v1019_v57 = vsel %vm986_vm0, %v3104_v63, %v975_v2 }
  0xb7   : > { %v977_v20 = vpop.permute.xlu1 %976 }
  0xb8   : > { %v1022_v33 = vsel %vm986_vm0, %v3105_v19, %v977_v20 }
  0xb9   : > { %3261 = vmatmul.mubr.msk.bf16.vlgmr.msra.gmra.mxu1 %vm986_vm0, %v3821_v58 }
  0xba   : > { %3268 = vmatprep.mubr.msk.bf16.mxu1 %vm3524_vm2, %v4881_v56 }
  0xbc   : > { %3243 = vmatmul.mubr.msk.bf16.gmra.mxu0 %vm1051_vm1, %v1016_v55 }
  0xbd   : > { %3246 = vmatprep.mubr.msk.bf16.mxu0 %vm1051_vm1, %v1019_v57  ;;  %v3995_v57 = vrot.slane %v3972_v31, %v3617_v11 }
  0xc4   : > { %3247 = vmatmul.mubr.msk.bf16.gmra.mxu0 %vm1051_vm1, %v1022_v33 }
 0x15c   : > { %v3910_v34 = vpop.f32.mrf.mxu0 }
 0x15e   : > { %v3912_v59 = vpop.f32.mrf.mxu0 }
 0x160   : > { %v3914_v14 = vpop.f32.mrf.mxu0 }
 0x162   : > { %v1121_v22 = vpop.f32.mrf.mxu0 }
 0x164   : > { %v3916_v21 = vpop.f32.mrf.mxu0 }
 0x166   : > { %v3918_v9 = vpop.f32.mrf.mxu0  ;;  %v3920_v10 = vpop.f32.mrf.mxu1 }
 0x168   : > { %v3922_v60 = vpop.f32.mrf.mxu0  ;;  %v3924_v61 = vpop.f32.mrf.mxu1 }
 0x16a   : > { %v3926_v7 = vpop.f32.mrf.mxu0  ;;  %v3928_v8 = vpop.f32.mrf.mxu1 }
 0x16c   : > { %v3930_v12 = vpop.f32.mrf.mxu0  ;;  %v3932_v15 = vpop.f32.mrf.mxu1 }
 0x16e   : > { %v3934_v16 = vpop.f32.mrf.mxu0 }
 0x170   : > { %v3936_v18 = vpop.f32.mrf.mxu0 }
 0x171   : > { %v3938_v26 = vpop.f32.mrf.mxu1 }
 0x172   : > { %v3940_v27 = vpop.f32.mrf.mxu0 }
 0x173   : > { %v3942_v28 = vpop.f32.mrf.mxu1 }
 0x174   : > { %v3944_v39 = vpop.f32.mrf.mxu0 }
 0x175   : > { %v3946_v40 = vpop.f32.mrf.mxu1 }
 0x176   : > { %v3948_v48 = vpop.f32.mrf.mxu0 }
 0x177   : > { %v3950_v46 = vpop.f32.mrf.mxu1 }
 0x178   : > { %v3241_v47 = vpop.f32.mrf.mxu0 }
 0x179   : > { %v1293_v1 = vpop.f32.mrf.mxu1 }
 0x17a   : > { %v1303_v29 = vcombine.high %v1293_v1, %v1293_v1  ;;  %v1169_v32 = vpop.f32.mrf.mxu0  ;;  %v1310_v36 = vrot.slane %v1293_v1, %v3603_v6 }
 0x17b   : > { %v3262_v35 = vpop.f32.mrf.mxu1 }
 0x17c   : > { %v1317_v42 = vrot.slane %v1303_v29, %v3603_v6  ;;  %v3244_v23 = vpop.f32.mrf.mxu0  ;;  %v3962_v51 = vrot.slane %v1310_v36, %v3603_v6  ;;  %v1318_v62 = vcombine.high %v1310_v36, %v1310_v36  ;;  %v4001_v29 = vrot.slane %v3972_v31, %v3976_v45 }
 0x17d   : > { %v3954_v13 = vpop.f32.mrf.mxu1 }
 0x17e   : > { %v1319_v4 = vcombine.high %v1317_v42, %v1317_v42  ;;  %v3957_v5 = vrot.slane %v1317_v42, %v3603_v6  ;;  %v1182_v24 = vpop.f32.mrf.mxu0  ;;  %v1359_v25 = vrot.slane %v3954_v13, %v3603_v6  ;;  %v1404_v53 = vrot.slane %v3962_v51, %v3617_v11 }
 0x17f   : > { %v3263_v50 = vpop.f32.mrf.mxu1 }
 0x180   : > { %v3245_v43 = vpop.f32.mrf.mxu0  ;;  %v3965_v44 = vrot.slane %v1319_v4, %v3603_v6  ;;  %v1349_v30 = vcombine.high %v3957_v5, %v3957_v5  ;;  %v1367_v37 = vcombine.high %v1359_v25, %v1359_v25  ;;  %v1375_v38 = vrot.slane %v1359_v25, %v3603_v6 }
 0x181   : > { %v4009_v4 = vrot.slane %v3972_v31, %v3979_v49  ;;  %v1482_v25 = vadd.f32 %v1404_v53, %v1121_v22 }
 0x182   : > { %v1185_v41 = vpop.f32.mrf.mxu0  ;;  %v1351_v52 = vcombine.high %v3965_v44, %v3965_v44  ;;  %v3984_v17 = vrot.slane %v1349_v30, %v3617_v11  ;;  %v1389_v54 = vrot.slane %v1367_v37, %v3603_v6  ;;  %v1436_v63 = vrot.slane %v1375_v38, %v3617_v11 }
 0x183   : > { %v1397_v1 = vcombine.high %v1375_v38, %v1375_v38 }
 0x184   : > { %v3248_v2 = vpop.f32.mrf.mxu0  ;;  %v3991_v55 = vrot.slane %v1351_v52, %v3617_v11  ;;  %v1494_v19 = vadd.f32 %v3984_v17, %v1169_v32  ;;  %v1440_v20 = vrot.slane %v1389_v54, %v3617_v11  ;;  %v1497_v42 = vadd.f32 %v1436_v63, %v1182_v24 }
 0x185   : > { %v1340_v32 = vrot.slane %v1318_v62, %v3603_v6  ;;  %v1498_v52 = vadd.f32 %v1436_v63, %v1185_v41  ;;  %v1444_v56 = vrot.slane %v1397_v1, %v3617_v11 }
 0x186   : > { %v1198_v33 = vpop.f32.mrf.mxu0  ;;  %v1496_v35 = vadd.f32 %v3241_v47, %v3991_v55  ;;  %v4005_v36 = vadd.f32 %v3995_v57, %v1494_v19  ;;  %v1499_v50 = vadd.f32 %v3244_v23, %v1440_v20  ;;  %v4018_v47 = vadd.f32 %v3995_v57, %v1497_v42 }
 0x187   : > { %v1500_v38 = vadd.f32 %v3245_v43, %v1440_v20  ;;  %v1399_v19 = vcombine.high %v1389_v54, %v1389_v54  ;;  %v4035_v41 = vadd.f32 %v3995_v57, %v1498_v52  ;;  %v1501_v63 = vadd.f32 %v1444_v56, %v1198_v33 }
 0x188   : > { %v4013_v30 = vadd.f32 %v3995_v57, %v1496_v35  ;;  %v1566_v37 = vmul.f32 %v4001_v29, %v4005_v36  ;;  %v4021_v24 = vadd.f32 %v3995_v57, %v1499_v50  ;;  %v3249_v62 = vpop.f32.mrf.mxu0  ;;  %v1569_v35 = vmul.f32 %v4001_v29, %v4018_v47 }
 0x189   : > { %v4030_v42 = vadd.f32 %v3995_v57, %v1500_v38  ;;  %4907 = vst [vmem:[#allocation7_spill] sm:$0xff] %v4035_v41  ;;  %v1448_v54 = vrot.slane %v1399_v19, %v3617_v11  ;;  %v1348_v20 = vcombine.high %v3962_v51, %v3962_v51  ;;  %v1352_v38 = vcombine.high %v3954_v13, %v3954_v13 }
 0x18a   : > { %v1568_v22 = vmul.f32 %v4001_v29, %v4013_v30  ;;  %v1602_v23 = vadd.f32 %v4009_v4, %v1566_v37  ;;  %v1571_v43 = vmul.f32 %v4001_v29, %v4021_v24  ;;  %v1570_v52 = vmul.f32 %v4001_v29, %v4035_v41  ;;  %v1201_v19 = vpop.f32.mrf.mxu0 }
 0x18b   : > { %4906 = vst [vmem:[#allocation6_spill] sm:$0xff] %v4030_v42  ;;  %v1572_v37 = vmul.f32 %v4001_v29, %v4030_v42  ;;  %v1503_v58 = vadd.f32 %v3248_v2, %v1448_v54  ;;  %v1350_v33 = vcombine.high %v1340_v32, %v1340_v32  ;;  %v1408_v45 = vrot.slane %v1340_v32, %v3617_v11 }
 0x18c   : > { %v1604_v1 = vadd.f32 %v4009_v4, %v1568_v22  ;;  %v3160_v50 = vmul.f32 -1.442695, %v1602_v23  ;;  %v1607_v0 = vadd.f32 %v4009_v4, %v1571_v43  ;;  %v1605_v51 = vadd.f32 %v4009_v4, %v1569_v35 }
 0x18d   : > { %v4051_v22 = vadd.f32 %v3995_v57, %v1482_v25  ;;  %v1481_v23 = vadd.f32 %v1404_v53, %v3912_v59  ;;  %v4055_v13 = vadd.f32 %v3995_v57, %v1501_v63  ;;  %v1608_v43 = vadd.f32 %v4009_v4, %v1572_v37 }
 0x18e   : > { %v3162_v49 = vmul.f32 -1.442695, %v1604_v1  ;;  %3329 = vpow2.f32 %v3160_v50  ;;  %v4059_v2 = vadd.f32 %v3995_v57, %v1503_v58  ;;  %v1504_v41 = vadd.f32 %v3249_v62, %v1448_v54 }
 0x18f   : > { %4908 = vst [vmem:[#allocation8_spill] sm:$0xff] %v4055_v13  ;;  %v1502_v42 = vadd.f32 %v1444_v56, %v1201_v19  ;;  %v1412_v32 = vrot.slane %v1348_v20, %v3617_v11  ;;  %v4064_v25 = vrot.slane %v3957_v5, %v3617_v11  ;;  %v3165_v35 = vmul.f32 -1.442695, %v1607_v0 }
 0x190   : > { %4909 = vst [vmem:[#allocation9_spill] sm:$0xff] %v4059_v2  ;;  %v1606_v59 = vadd.f32 %v4009_v4, %v1570_v52  ;;  %v4068_v53 = vrot.slane %v1350_v33, %v3617_v11  ;;  %v3163_v63 = vmul.f32 -1.442695, %v1605_v51  ;;  %v4071_v1 = vadd.f32 %v3995_v57, %v1504_v41 }
 0x191   : > { %v1554_v58 = vmul.f32 %v4001_v29, %v4051_v22  ;;  %3331 = vpow2.f32 %v3162_v49  ;;  %v4076_v56 = vrot.slane %v1352_v38, %v3603_v6  ;;  %v4079_v5 = vadd.f32 %v3995_v57, %v1502_v42 }
 0x192   : > { %v4082_v0 = vadd.f32 %v3995_v57, %v1481_v23  ;;  %v3166_v62 = vmul.f32 -1.442695, %v1608_v43  ;;  %v1575_v54 = vmul.f32 %v4001_v29, %v4059_v2  ;;  %v1573_v41 = vmul.f32 %v4001_v29, %v4055_v13 }
 0x193   : > { %4910 = vst [vmem:[#allocation10_spill] sm:$0xff] %v4079_v5  ;;  %v1590_v20 = vadd.f32 %v4009_v4, %v1554_v58  ;;  %3333 = vpow2.f32 %v3165_v35  ;;  %v3164_v49 = vmul.f32 -1.442695, %v1606_v59  ;;  %v1485_v42 = vadd.f32 %v1412_v32, %v3918_v9 }
 0x194   : > { %v1553_v50 = vmul.f32 %v4001_v29, %v4082_v0  ;;  %3335 = vpow2.f32 %v3163_v63  ;;  %v1576_v37 = vmul.f32 %v4001_v29, %v4071_v1  ;;  %v1483_v52 = vadd.f32 %v3910_v34, %v1408_v45 }
 0x195   : > { %v3148_v38 = vmul.f32 -1.442695, %v1590_v20  ;;  %v1574_v19 = vmul.f32 %v4001_v29, %v4079_v5  ;;  %v4099_v51 = vadd.f32 %v3995_v57, %v1485_v42  ;;  %v1484_v23 = vadd.f32 %v3914_v14, %v1408_v45 }
 0x196   : > { %v1589_v33 = vadd.f32 %v4009_v4, %v1553_v50  ;;  %v1611_v43 = vadd.f32 %v4009_v4, %v1575_v54  ;;  %v1609_v9 = vadd.f32 %v4009_v4, %v1573_v41  ;;  %v4105_v35 = vadd.f32 %v3995_v57, %v1483_v52 }
 0x197   : > { %3337 = vpow2.f32 %v3148_v38  ;;  %v1557_v34 = vmul.f32 %v4001_v29, %v4099_v51  ;;  %v4110_v63 = vadd.f32 %v3995_v57, %v1484_v23  ;;  %v1489_v58 = vadd.f32 %v4064_v25, %v3934_v16 }
 0x198   : > { %v3147_v59 = vmul.f32 -1.442695, %v1589_v33  ;;  %v1612_v14 = vadd.f32 %v4009_v4, %v1576_v37  ;;  %v1555_v45 = vmul.f32 %v4001_v29, %v4105_v35  ;;  %v1486_v54 = vadd.f32 %v1412_v32, %v3926_v7 }
 0x199   : > { %v1487_v41 = vadd.f32 %v3916_v21, %v4068_v53  ;;  %v4121_v20 = vsub.s32 4, %v3594_v3  ;;  %3339 = vpow2.f32 %v3166_v62  ;;  %v1610_v50 = vadd.f32 %v4009_v4, %v1574_v19 }
 0x19a   : > { %v1593_v42 = vadd.f32 %v4009_v4, %v1557_v34  ;;  %v4127_v16 = vrot.slane %v4076_v56, %v3603_v6  ;;  %v3167_v37 = vmul.f32 -1.442695, %v1609_v9  ;;  %3341 = vpow2.f32 %v3147_v59 }
 0x19b   : > { %4911 = vst [vmem:[#allocation11_spill] sm:$0xff] %v4121_v20  ;;  %v3330_v38 = vpop.eup %3329  ;;  %v1556_v7 = vmul.f32 %v4001_v29, %v4110_v63  ;;  %v3169_v32 = vmul.f32 -1.442695, %v1611_v43  ;;  %v4132_v52 = vadd.f32 %v3995_v57, %v1489_v58  ;;  %v4135_v62 = vadd.f32 %v3995_v57, %v1486_v54 }
 0x19c   : > { %v3151_v21 = vmul.f32 -1.442695, %v1593_v42  ;;  %3343 = vpow2.f32 %v3164_v49  ;;  %v3170_v19 = vmul.f32 -1.442695, %v1612_v14  ;;  %v1591_v33 = vadd.f32 %v4009_v4, %v1555_v45 }
 0x19d   : > { %v4139_v23 = vadd.f32 %v3995_v57, %v1487_v41  ;;  %v1424_v9 = vrot.slane %v3965_v44, %v3617_v11  ;;  %v1368_v43 = vcombine.high %v4076_v56, %v4076_v56  ;;  %v3168_v59 = vmul.f32 -1.442695, %v1610_v50 }
 0x19e   : > { %3345 = vpow2.f32 %v3151_v21  ;;  %v3332_v34 = vpop.eup %3331  ;;  %v1493_v58 = vadd.f32 %v3984_v17, %v3948_v48  ;;  %v1730_v54 = vadd.f32 1.0, %v3330_v38  ;;  %v1592_v49 = vadd.f32 %v4009_v4, %v1556_v7 }
 0x19f   : > { %3347 = vpow2.f32 %v3167_v37  ;;  %v1561_v14 = vmul.f32 %v4001_v29, %v4132_v52  ;;  %v1558_v44 = vmul.f32 %v4001_v29, %v4135_v62  ;;  %v1490_v56 = vadd.f32 %v4064_v25, %v3940_v27 }
 0x1a0   : > { %3349 = vpow2.f32 %v3169_v32  ;;  %v4154_v45 = vpop.eup %3333  ;;  %v1452_v41 = vrot.slane %v4127_v16, %v3617_v11  ;;  %v3149_v48 = vmul.f32 -1.442695, %v1591_v33  ;;  %v1559_v17 = vmul.f32 %v4001_v29, %v4139_v23 }
 0x1a1   : > { %3351 = vpow2.f32 %v3170_v19  ;;  %v4160_v50 = vpop.eup %3335  ;;  %v1732_v42 = vadd.f32 1.0, %v3332_v34  ;;  %v4163_v38 = vadd.f32 %v3995_v57, %v1490_v56  ;;  %v1491_v37 = vadd.f32 %v3930_v12, %v1424_v9 }
 0x1a2   : > { %3353 = vpow2.f32 %v3168_v59  ;;  %v3150_v27 = vmul.f32 -1.442695, %v1592_v49  ;;  %v1488_v25 = vadd.f32 %v3922_v60, %v4068_v53  ;;  %v4169_v7 = vadd.f32 %v3995_v57, %v1493_v58 }
 0x1a3   : > { %3355 = vrcp.f32 %v1730_v54  ;;  %v1597_v21 = vadd.f32 %v4009_v4, %v1561_v14  ;;  %v1594_v19 = vadd.f32 %v4009_v4, %v1558_v44  ;;  %v1562_v33 = vmul.f32 %v4001_v29, %v4163_v38 }
 0x1a4   : > { %v3338_v32 = vpop.eup %3337  ;;  %v4176_v59 = vadd.f32 %v3995_v57, %v1491_v37  ;;  %3357 = vpow2.f32 %v3149_v48  ;;  %v1595_v34 = vadd.f32 %v4009_v4, %v1559_v17  ;;  %v4180_v60 = vadd.f32 %v3995_v57, %v1488_v25 }
 0x1a5   : > { %v1718_v12 = vadd.f32 1.0, %v3338_v32  ;;  %3359 = vrcp.f32 %v1732_v42  ;;  %v1565_v58 = vmul.f32 %v4001_v29, %v4169_v7  ;;  %v1492_v54 = vadd.f32 %v3936_v18, %v1424_v9 }
 0x1a6   : > { %v1563_v53 = vmul.f32 %v4001_v29, %v4176_v59  ;;  %v4187_v49 = vpop.eup %3339  ;;  %v1495_v14 = vadd.f32 %v3944_v39, %v3991_v55  ;;  %v1598_v44 = vadd.f32 %v4009_v4, %v1562_v33  ;;  %v1560_v56 = vmul.f32 %v4001_v29, %v4180_v60 }
 0x1a7   : > { %3361 = vrcp.f32 %v1718_v12  ;;  %v3342_v48 = vpop.eup %3341  ;;  %v4195_v17 = vsub.s32 3, %v3594_v3  ;;  %v4198_v42 = vrot.slane %v1368_v43, %v3603_v6  ;;  %v3155_v18 = vmul.f32 -1.442695, %v1597_v21 }
 0x1a8   : > { %3363 = vpow2.f32 %v3150_v27  ;;  %v1717_v9 = vadd.f32 1.0, %v3342_v48  ;;  %v3152_v37 = vmul.f32 -1.442695, %v1594_v19  ;;  %v3153_v25 = vmul.f32 -1.442695, %v1595_v34 }
 0x1a9   : > { %4912 = vst [vmem:[#allocation12_spill] sm:$0xff] %v4195_v17  ;;  %v1599_v39 = vadd.f32 %v4009_v4, %v1563_v53  ;;  %v4201_v55 = vpop.eup %3343  ;;  %v1596_v32 = vadd.f32 %v4009_v4, %v1560_v56  ;;  %v1601_v33 = vadd.f32 %v4009_v4, %v1565_v58  ;;  %v4206_v12 = vadd.f32 %v3995_v57, %v1492_v54 }
 0x1aa   : > { %v1505_v13 = vadd.f32 %v1452_v41, %v3924_v61  ;;  %3365 = vrcp.f32 %v1717_v9  ;;  %v3156_v43 = vmul.f32 -1.442695, %v1598_v44  ;;  %v1506_v27 = vadd.f32 %v1452_v41, %v3932_v15 }
 0x1ab   : > { %v3346_v6 = vpop.eup %3345  ;;  %v4211_v21 = vadd.f32 %v3995_v57, %v1495_v14  ;;  %3367 = vpow2.f32 %v3155_v18  ;;  %v1564_v53 = vmul.f32 %v4001_v29, %v4206_v12  ;;  %v3157_v61 = vmul.f32 -1.442695, %v1599_v39 }
 0x1ac   : > { %v4213_v19 = vpop.eup %3347  ;;  %v1721_v34 = vadd.f32 1.0, %v3346_v6  ;;  %v4218_v58 = vadd.f32 %v3995_v57, %v1505_v13  ;;  %3369 = vpow2.f32 %v3152_v37  ;;  %v4223_v44 = vadd.f32 %v3995_v57, %v1506_v27 }
 0x1ad   : > { %v4220_v54 = vpop.eup %3349  ;;  %v1567_v15 = vmul.f32 %v4001_v29, %v4211_v21  ;;  %v3154_v14 = vmul.f32 -1.442695, %v1596_v32  ;;  %v1600_v56 = vadd.f32 %v4009_v4, %v1564_v53  ;;  %v1398_v18 = vcombine.high %v4127_v16, %v4127_v16 }
 0x1ae   : > { %v4227_v41 = vpop.eup %3351  ;;  %3371 = vrcp.f32 %v1721_v34  ;;  %v1577_v13 = vmul.f32 %v4001_v29, %v4218_v58  ;;  %v3159_v9 = vmul.f32 -1.442695, %v1601_v33  ;;  %v1578_v37 = vmul.f32 %v4001_v29, %v4223_v44 }
 0x1af   : > { %v4232_v48 = vpop.eup %3353  ;;  %3373 = vpow2.f32 %v3153_v25  ;;  %v1456_v32 = vrot.slane %v4198_v42, %v3617_v11  ;;  %v3158_v6 = vmul.f32 -1.442695, %v1600_v56  ;;  %v4245_v34 = vrot.slane %v3972_v31, %v4121_v20 }
 0x1b0   : > { %v4238_v39 = vpop.eup %3355  ;;  %3375 = vpow2.f32 %v3156_v43  ;;  %v1613_v27 = vadd.f32 %v4009_v4, %v1577_v13  ;;  %v1614_v16 = vadd.f32 %v4009_v4, %v1578_v37  ;;  %v1603_v25 = vadd.f32 %v4009_v4, %v1567_v15 }
 0x1b1   : > { %3377 = vpow2.f32 %v3157_v61  ;;  %v3358_v33 = vpop.eup %3357  ;;  %v4250_v53 = vsub.s32 5, %v3594_v3  ;;  %v4256_v43 = vrot.slane %v3972_v31, %v4195_v17  ;;  %v1460_v37 = vrot.slane %v1398_v18, %v3617_v11 }
 0x1b2   : > { %3379 = vpow2.f32 %v3154_v14  ;;  %v3171_v2 = vmul.f32 -1.442695, %v1613_v27  ;;  %v4252_v5 = vpop.eup %3359  ;;  %v1719_v56 = vadd.f32 1.0, %v3358_v33  ;;  %v3172_v13 = vmul.f32 -1.442695, %v1614_v16 }
 0x1b3   : > { %4913 = vst [vmem:[#allocation13_spill] sm:$0xff] %v4250_v53  ;;  %3381 = vpow2.f32 %v3159_v9  ;;  %v1507_v15 = vadd.f32 %v3920_v10, %v1456_v32  ;;  %v3161_v14 = vmul.f32 -1.442695, %v1603_v25  ;;  %v1508_v27 = vadd.f32 %v3928_v8, %v1456_v32 }
 0x1b4   : > { %v3362_v61 = vpop.eup %3361  ;;  %3383 = vpow2.f32 %v3158_v6  ;;  %v4264_v17 = vrot.slane %v3972_v31, %v4250_v53  ;;  %v1735_v9 = vadd.f32 1.0, %v4154_v45  ;;  %v1400_v8 = vcombine.high %v4198_v42, %v4198_v42 }
 0x1b5   : > { %v3364_v20 = vpop.eup %3363  ;;  %v1818_v3 = vmul.f32 %v3362_v61, %v4245_v34  ;;  %3385 = vrcp.f32 %v1719_v56  ;;  %v4269_v10 = vadd.f32 %v3995_v57, %v1507_v15  ;;  %v4272_v6 = vadd.f32 %v3995_v57, %v1508_v27 }
 0x1b6   : > { %v1720_v16 = vadd.f32 1.0, %v3364_v20  ;;  %3387 = vpow2.f32 %v3171_v2  ;;  %v1733_v31 = vadd.f32 1.0, %v4160_v50  ;;  %v1509_v45 = vadd.f32 %v1460_v37, %v3942_v28 }
 0x1b7   : > { %v1854_v18 = vadd.f32 %v4256_v43, %v1818_v3  ;;  %3389 = vpow2.f32 %v3172_v13  ;;  %v3366_v25 = vpop.eup %3365  ;;  %v1579_v32 = vmul.f32 %v4001_v29, %v4269_v10  ;;  %v1580_v42 = vmul.f32 %v4001_v29, %v4272_v6 }
 0x1b8   : > { %3391 = vrcp.f32 %v1720_v16  ;;  %v3368_v20 = vpop.eup %3367  ;;  %v1817_v3 = vmul.f32 %v3366_v25, %v4245_v34  ;;  %v4285_v50 = vadd.f32 %v3995_v57, %v1509_v45  ;;  %v1510_v16 = vadd.f32 %v1460_v37, %v3950_v46 }
 0x1b9   : > { %v1886_v2 = vmul.f32 %v1854_v18, %v4051_v22  ;;  %3393 = vpow2.f32 %v3161_v14  ;;  %v3370_v33 = vpop.eup %3369  ;;  %v1725_v56 = vadd.f32 1.0, %v3368_v20  ;;  %v1615_v15 = vadd.f32 %v4009_v4, %v1579_v32 }
 0x1ba   : > { %3395 = vrcp.f32 %v1735_v9  ;;  %v1853_v22 = vadd.f32 %v4256_v43, %v1817_v3  ;;  %v1722_v61 = vadd.f32 1.0, %v3370_v33  ;;  %v1581_v9 = vmul.f32 %v4001_v29, %v4285_v50 }
 0x1bb   : > { %v3372_v13 = vpop.eup %3371  ;;  %v1922_v28 = vmul.f32 %v4264_v17, %v1886_v2  ;;  %3397 = vrcp.f32 %v1725_v56  ;;  %v1616_v33 = vadd.f32 %v4009_v4, %v1580_v42  ;;  %v3173_v37 = vmul.f32 -1.442695, %v1615_v15 }
 0x1bc   : > { %v3374_v14 = vpop.eup %3373  ;;  %v1821_v27 = vmul.f32 %v3372_v13, %v4245_v34  ;;  %v1885_v45 = vmul.f32 %v1853_v22, %v4082_v0  ;;  %3399 = vrcp.f32 %v1722_v61  ;;  %v4301_v22 = vadd.f32 %v3995_v57, %v1510_v16 }
 0x1bd   : > { %v3376_v18 = vpop.eup %3375  ;;  %v1956_v25 = vsel %vm1051_vm1, %v1922_v28, 0.0  ;;  %v1723_v20 = vadd.f32 1.0, %v3374_v14  ;;  %3401 = vrcp.f32 %v1733_v31  ;;  %v1617_v42 = vadd.f32 %v4009_v4, %v1581_v9 }
 0x1be   : > { %v3378_v2 = vpop.eup %3377  ;;  %1957 = vadd.xlane.f32.xlu1 %v1956_v25  ;;  %v1857_v3 = vadd.f32 %v4256_v43, %v1821_v27  ;;  %v1726_v32 = vadd.f32 1.0, %v3376_v18  ;;  %v1921_v13 = vmul.f32 %v4264_v17, %v1885_v45  ;;  %v3174_v45 = vmul.f32 -1.442695, %v1616_v33 }
 0x1bf   : > { %v3380_v56 = vpop.eup %3379  ;;  %3403 = vrcp.f32 %v1723_v20  ;;  %v1727_v46 = vadd.f32 1.0, %v3378_v2  ;;  %v1464_v20 = vrot.slane %v1400_v8, %v3617_v11  ;;  %v3175_v33 = vmul.f32 -1.442695, %v1617_v42 }
 0x1c0   : > { %v3382_v53 = vpop.eup %3381  ;;  %v1889_v28 = vmul.f32 %v1857_v3, %v4099_v51  ;;  %3405 = vrcp.f32 %v1726_v32  ;;  %v1724_v0 = vadd.f32 1.0, %v3380_v56  ;;  %v1953_v61 = vsel %vm1051_vm1, %v1921_v13, 0.0 }
 0x1c1   : > { %v3384_v31 = vpop.eup %3383  ;;  %3407 = vrcp.f32 %v1727_v46  ;;  %v1729_v14 = vadd.f32 1.0, %v3382_v53  ;;  %1954 = vadd.xlane.f32.xlu0 %v1953_v61  ;;  %v1582_v51 = vmul.f32 %v4001_v29, %v4301_v22  ;;  %v1512_v8 = vadd.f32 %v3946_v40, %v1464_v20 }
 0x1c2   : > { %v3386_v27 = vpop.eup %3385  ;;  %v1925_v18 = vmul.f32 %v4264_v17, %v1889_v28  ;;  %3409 = vrcp.f32 %v1724_v0  ;;  %v1728_v15 = vadd.f32 1.0, %v3384_v31  ;;  %v1511_v40 = vadd.f32 %v3938_v26, %v1464_v20 }
 0x1c3   : > { %v3388_v25 = vpop.eup %3387  ;;  %v1819_v16 = vmul.f32 %v3386_v27, %v4245_v34  ;;  %3411 = vrcp.f32 %v1729_v14  ;;  %v1618_v3 = vadd.f32 %v4009_v4, %v1582_v51 }
 0x1c4   : > { %v3390_v2 = vpop.eup %3389  ;;  %v1965_v53 = vsel %vm1051_vm1, %v1925_v18, 0.0  ;;  %3413 = vrcp.f32 %v1728_v15  ;;  %v1741_v9 = vadd.f32 1.0, %v3388_v25  ;;  %v4320_v18 = vadd.f32 %v3995_v57, %v1512_v8 }
 0x1c5   : > { %v3392_v32 = vpop.eup %3391  ;;  %1966 = vadd.xlane.f32.xlu1 %v1965_v53  ;;  %v1855_v56 = vadd.f32 %v4256_v43, %v1819_v16  ;;  %v1742_v13 = vadd.f32 1.0, %v3390_v2  ;;  %3415 = vpow2.f32 %v3173_v37  ;;  %v3176_v14 = vmul.f32 -1.442695, %v1618_v3 }
 0x1c6   : > { %v3394_v46 = vpop.eup %3393  ;;  %v1820_v28 = vmul.f32 %v3392_v32, %v4245_v34  ;;  %3417 = vrcp.f32 %v1741_v9  ;;  %v1736_v15 = vadd.f32 1.0, %v4187_v49  ;;  %v1584_v16 = vmul.f32 %v4001_v29, %v4320_v18 }
 0x1c7   : > { %v4315_v0 = vpop.eup %3395  ;;  %v1887_v31 = vmul.f32 %v1855_v56, %v4105_v35  ;;  %3419 = vrcp.f32 %v1742_v13  ;;  %v1731_v61 = vadd.f32 1.0, %v3394_v46  ;;  %v1734_v9 = vadd.f32 1.0, %v4201_v55 }
 0x1c8   : > { %v1856_v27 = vadd.f32 %v4256_v43, %v1820_v28  ;;  %3421 = vpow2.f32 %v3174_v45  ;;  %v3398_v37 = vpop.eup %3397  ;;  %v1620_v20 = vadd.f32 %v4009_v4, %v1584_v16  ;;  %v1830_v13 = vmul.f32 %v4238_v39, %v4245_v34 }
 0x1c9   : > { %v1923_v42 = vmul.f32 %v4264_v17, %v1887_v31  ;;  %3423 = vrcp.f32 %v1731_v61  ;;  %v3400_v51 = vpop.eup %3399  ;;  %v1825_v25 = vmul.f32 %v3398_v37, %v4245_v34  ;;  %v4344_v8 = vadd.f32 %v3995_v57, %v1511_v40 }
 0x1ca   : > { %v1888_v35 = vmul.f32 %v1856_v27, %v4110_v63  ;;  %3425 = vpow2.f32 %v3175_v33  ;;  %v4329_v45 = vpop.eup %3401  ;;  %v1822_v49 = vmul.f32 %v3400_v51, %v4245_v34  ;;  %v3178_v33 = vmul.f32 -1.442695, %v1620_v20 }
 0x1cb   : > { %v1959_v2 = vsel %vm1051_vm1, %v1923_v42, 0.0  ;;  %3427 = vpow2.f32 %v3176_v14  ;;  %v1861_v63 = vadd.f32 %v4256_v43, %v1825_v25 }
 0x1cc   : > { %v3404_v53 = vpop.eup %3403  ;;  %1960 = vadd.xlane.f32.xlu0 %v1959_v2  ;;  %v1924_v26 = vmul.f32 %v4264_v17, %v1888_v35  ;;  %3429 = vrcp.f32 %v1736_v15  ;;  %v1858_v32 = vadd.f32 %v4256_v43, %v1822_v49 }
 0x1cd   : > { %v3406_v3 = vpop.eup %3405  ;;  %v1823_v56 = vmul.f32 %v3404_v53, %v4245_v34  ;;  %v1893_v28 = vmul.f32 %v1861_v63, %v4132_v52  ;;  %3431 = vpow2.f32 %v3178_v33 }
 0x1ce   : > { %v3408_v46 = vpop.eup %3407  ;;  %v1826_v55 = vmul.f32 %v3406_v3, %v4245_v34  ;;  %v1962_v61 = vsel %vm1051_vm1, %v1924_v26, 0.0  ;;  %v1890_v14 = vmul.f32 %v1858_v32, %v4135_v62  ;;  %3433 = vrcp.f32 %v1734_v9 }
 0x1cf   : > { %v3410_v31 = vpop.eup %3409  ;;  %v1859_v27 = vadd.f32 %v4256_v43, %v1823_v56  ;;  %v1827_v37 = vmul.f32 %v3408_v46, %v4245_v34  ;;  %v1929_v39 = vmul.f32 %v4264_v17, %v1893_v28 }
 0x1d0   : > { %v3412_v15 = vpop.eup %3411  ;;  %1963 = vadd.xlane.f32.xlu0 %v1962_v61  ;;  %v1862_v52 = vadd.f32 %v4256_v43, %v1826_v55  ;;  %v1824_v42 = vmul.f32 %v3410_v31, %v4245_v34  ;;  %v1926_v40 = vmul.f32 %v4264_v17, %v1890_v14 }
 0x1d1   : > { %v3414_v57 = vpop.eup %3413  ;;  %v1891_v51 = vmul.f32 %v1859_v27, %v4139_v23  ;;  %v1863_v62 = vadd.f32 %v4256_v43, %v1827_v37  ;;  %v1829_v35 = vmul.f32 %v3412_v15, %v4245_v34  ;;  %v1977_v16 = vsel %vm1051_vm1, %v1929_v39, 0.0 }
 0x1d2   : > { %v3416_v25 = vpop.eup %3415  ;;  %v1894_v2 = vmul.f32 %v1862_v52, %v4163_v38  ;;  %v1860_v49 = vadd.f32 %v4256_v43, %v1824_v42  ;;  %v1828_v53 = vmul.f32 %v3414_v57, %v4245_v34  ;;  %1978 = vadd.xlane.f32.xlu1 %v1977_v16  ;;  %v1968_v63 = vsel %vm1051_vm1, %v1926_v40, 0.0 }
 0x1d3   : > { %v3418_v26 = vpop.eup %3417  ;;  %v1927_v20 = vmul.f32 %v4264_v17, %v1891_v51  ;;  %v1895_v23 = vmul.f32 %v1863_v62, %v4176_v59  ;;  %v1865_v3 = vadd.f32 %v4256_v43, %v1829_v35  ;;  %v1866_v57 = vadd.f32 %v4256_v43, %v1830_v13 }
 0x1d4   : > { %v3420_v32 = vpop.eup %3419  ;;  %1969 = vadd.xlane.f32.xlu0 %v1968_v63  ;;  %v1930_v56 = vmul.f32 %v4264_v17, %v1894_v2  ;;  %v1892_v38 = vmul.f32 %v1860_v49, %v4180_v60  ;;  %v1864_v46 = vadd.f32 %v4256_v43, %v1828_v53  ;;  %v1841_v28 = vmul.f32 %v3418_v26, %v4245_v34 }
 0x1d5   : > { %v3422_v55 = vpop.eup %3421  ;;  %v1931_v33 = vmul.f32 %v4264_v17, %v1895_v23  ;;  %v1897_v31 = vmul.f32 %v1865_v3, %v4169_v7  ;;  %v1842_v59 = vmul.f32 %v3420_v32, %v4245_v34  ;;  %v1971_v14 = vsel %vm1051_vm1, %v1927_v20, 0.0 }
 0x1d6   : > { %v3424_v61 = vpop.eup %3423  ;;  %v1928_v27 = vmul.f32 %v4264_v17, %v1892_v38  ;;  %v1877_v37 = vadd.f32 %v4256_v43, %v1841_v28  ;;  %v1835_v60 = vmul.f32 %v4315_v0, %v4245_v34  ;;  %1972 = vadd.xlane.f32.xlu1 %v1971_v14  ;;  %v1980_v9 = vsel %vm1051_vm1, %v1930_v56, 0.0 }
 0x1d7   : > { %v3426_v15 = vpop.eup %3425  ;;  %v1896_v39 = vmul.f32 %v1864_v46, %v4206_v12  ;;  %v1878_v7 = vadd.f32 %v4256_v43, %v1842_v59  ;;  %v1831_v52 = vmul.f32 %v3424_v61, %v4245_v34  ;;  %v1832_v40 = vmul.f32 %v4252_v5, %v4245_v34 }
 0x1d8   : > { %v3428_v42 = vpop.eup %3427  ;;  %1981 = vadd.xlane.f32.xlu0 %v1980_v9  ;;  %v1743_v51 = vadd.f32 1.0, %v3416_v25  ;;  %v1583_v0 = vmul.f32 %v4001_v29, %v4344_v8  ;;  %v1983_v62 = vsel %vm1051_vm1, %v1931_v33, 0.0  ;;  %v1974_v35 = vsel %vm1051_vm1, %v1928_v27, 0.0 }
 0x1d9   : > { %v1933_v12 = vmul.f32 %v4264_v17, %v1897_v31  ;;  %v1744_v16 = vadd.f32 1.0, %v3422_v55  ;;  %v4389_v2 = vpop.eup %3429  ;;  %v1909_v49 = vmul.f32 %v1877_v37, %v4218_v58  ;;  %v1867_v13 = vadd.f32 %v4256_v43, %v1831_v52 }
 0x1da   : > { %3435 = vrcp.f32 %v1743_v51  ;;  %v1745_v53 = vadd.f32 1.0, %v3426_v15  ;;  %1984 = vadd.xlane.f32.xlu1 %v1983_v62  ;;  %v1932_v5 = vmul.f32 %v4264_v17, %v1896_v39  ;;  %v1910_v29 = vmul.f32 %v1878_v7, %v4223_v44  ;;  %v3432_v63 = vpop.eup %3431 }
 0x1db   : > { %3437 = vrcp.f32 %v1744_v16  ;;  %v1746_v25 = vadd.f32 1.0, %v3428_v42  ;;  %v1619_v26 = vadd.f32 %v4009_v4, %v1583_v0  ;;  %v1989_v20 = vsel %vm1051_vm1, %v1933_v12, 0.0  ;;  %v4405_v55 = vpop.eup %3433 }
 0x1dc   : > { %1975 = vadd.xlane.f32.xlu0 %v1974_v35  ;;  %3439 = vrcp.f32 %v1745_v53  ;;  %v1871_v58 = vadd.f32 %v4256_v43, %v1835_v60  ;;  %v1945_v23 = vmul.f32 %v4264_v17, %v1909_v49  ;;  %v1899_v3 = vmul.f32 %v1867_v13, %v4211_v21 }
 0x1dd   : > { %3441 = vrcp.f32 %v1746_v25  ;;  %v1748_v32 = vadd.f32 1.0, %v3432_v63  ;;  %v3177_v56 = vmul.f32 -1.442695, %v1619_v26  ;;  %v1986_v44 = vsel %vm1051_vm1, %v1932_v5, 0.0 }
 0x1de   : > { %1990 = vadd.xlane.f32.xlu1 %v1989_v20  ;;  %v1946_v38 = vmul.f32 %v4264_v17, %v1910_v29  ;;  %v1898_v46 = vmul.f32 %v1866_v57, %v4005_v36  ;;  %v1868_v4 = vadd.f32 %v4256_v43, %v1832_v40  ;;  %v1740_v28 = vadd.f32 1.0, %v4227_v41 }
 0x1df   : > { %3443 = vrcp.f32 %v1748_v32  ;;  %v2025_v21 = vsel %vm1051_vm1, %v1945_v23, 0.0  ;;  %v1935_v33 = vmul.f32 %v4264_v17, %v1899_v3  ;;  %v1903_v31 = vmul.f32 %v1871_v58, %v4021_v24 }
 0x1e0   : > { %1987 = vadd.xlane.f32.xlu0 %v1986_v44  ;;  %3445 = vpow2.f32 %v3177_v56  ;;  %v2028_v59 = vsel %vm1051_vm1, %v1946_v38, 0.0  ;;  %v1934_v36 = vmul.f32 %v4264_v17, %v1898_v46  ;;  %v1900_v61 = vmul.f32 %v1868_v4, %v4013_v30  ;;  %v4914_v46 = vld [vmem:[#allocation6_spill] sm:$0xff] }
 0x1e1   : > { %v3525_v14 = vmov 0   ;;  %3447 = vrcp.f32 %v1740_v28  ;;  %v1738_v41 = vadd.f32 1.0, %v4232_v48  ;;  %v1739_v27 = vadd.f32 1.0, %v4220_v54 }
 0x1e2   : > { %2026 = vadd.xlane.f32.xlu1 %v2025_v21  ;;  %3302 = vset.pattern.permute.xlu0 %v3525_v14  ;;  %v1995_v37 = vsel %vm1051_vm1, %v1935_v33, 0.0  ;;  %v1939_v24 = vmul.f32 %v4264_v17, %v1903_v31  ;;  %v1992_v15 = vsel %vm1051_vm1, %v1934_v36, 0.0  ;;  %v1936_v9 = vmul.f32 %v4264_v17, %v1900_v61 }
 0x1e3   : > { %3301 = vset.pattern.permute.xlu1 %v3525_v14  ;;  %v1833_v30 = vmul.f32 %v4329_v45, %v4245_v34  ;;  %v1737_v54 = vadd.f32 1.0, %v4213_v19  ;;  %3449 = vrcp.f32 %v1738_v41  ;;  %v1836_v16 = vmul.f32 %v4389_v2, %v4245_v34  ;;  %v4915_v14 = vld [vmem:[#allocation7_spill] sm:$0xff] }
 0x1e4   : > { %2029 = vadd.xlane.f32.xlu0 %v2028_v59  ;;  %3451 = vrcp.f32 %v1739_v27  ;;  %v2007_v57 = vsel %vm1051_vm1, %v1939_v24, 0.0  ;;  %v1998_v45 = vsel %vm1051_vm1, %v1936_v9, 0.0 }
 0x1e5   : > { %v1869_v19 = vadd.f32 %v4256_v43, %v1833_v30  ;;  %3453 = vrcp.f32 %v1737_v54  ;;  %v1872_v3 = vadd.f32 %v4256_v43, %v1836_v16 }
 0x1e6   : > { %1996 = vadd.xlane.f32.xlu1 %v1995_v37 }
 0x1e7   : > { %v3436_v60 = vpop.eup %3435  ;;  %v1901_v20 = vmul.f32 %v1869_v19, %v4018_v47  ;;  %v1904_v4 = vmul.f32 %v1872_v3, %v4914_v46 }
 0x1e8   : > { %v3438_v39 = vpop.eup %3437  ;;  %1993 = vadd.xlane.f32.xlu0 %v1992_v15  ;;  %v1843_v7 = vmul.f32 %v3436_v60, %v4245_v34 }
 0x1e9   : > { %v3440_v48 = vpop.eup %3439  ;;  %v1844_v52 = vmul.f32 %v3438_v39, %v4245_v34  ;;  %v1937_v38 = vmul.f32 %v4264_v17, %v1901_v20  ;;  %v1940_v36 = vmul.f32 %v4264_v17, %v1904_v4 }
 0x1ea   : > { %v3442_v42 = vpop.eup %3441  ;;  %v1879_v40 = vadd.f32 %v4256_v43, %v1843_v7  ;;  %v1845_v51 = vmul.f32 %v3440_v48, %v4245_v34  ;;  %2008 = vadd.xlane.f32.xlu1 %v2007_v57 }
 0x1eb   : > { %v1880_v0 = vadd.f32 %v4256_v43, %v1844_v52  ;;  %v1846_v62 = vmul.f32 %v3442_v42, %v4245_v34  ;;  %v2010_v15 = vsel %vm1051_vm1, %v1940_v36, 0.0 }
 0x1ec   : > { %1999 = vadd.xlane.f32.xlu0 %v1998_v45  ;;  %v1911_v35 = vmul.f32 %v1879_v40, %v4269_v10  ;;  %v1881_v12 = vadd.f32 %v4256_v43, %v1845_v51  ;;  %v3444_v49 = vpop.eup %3443  ;;  %v4916_v51 = vld [vmem:[#allocation10_spill] sm:$0xff] }
 0x1ed   : > { %v1912_v13 = vmul.f32 %v1880_v0, %v4272_v6  ;;  %v1882_v53 = vadd.f32 %v4256_v43, %v1846_v62  ;;  %v3446_v5 = vpop.eup %3445  ;;  %v1848_v26 = vmul.f32 %v3444_v49, %v4245_v34  ;;  %v4917_v0 = vld [vmem:[#allocation9_spill] sm:$0xff] }
 0x1ee   : > { %v1947_v29 = vmul.f32 %v4264_v17, %v1911_v35  ;;  %v1913_v25 = vmul.f32 %v1881_v12, %v4285_v50  ;;  %v1747_v2 = vadd.f32 1.0, %v3446_v5  ;;  %v3448_v56 = vpop.eup %3447 }
 0x1ef   : > { %v1948_v10 = vmul.f32 %v4264_v17, %v1912_v13  ;;  %v1914_v63 = vmul.f32 %v1882_v53, %v4301_v22  ;;  %v1884_v23 = vadd.f32 %v4256_v43, %v1848_v26  ;;  %v1834_v22 = vmul.f32 %v4405_v55, %v4245_v34  ;;  %v4918_v13 = vld [vmem:[#allocation8_spill] sm:$0xff]  ;;  %v2051_v26 = vld [vmem:[%s387_s20] sm:$0xff] }
 0x1f0   : > { %v2031_v58 = vsel %vm1051_vm1, %v1947_v29, 0.0  ;;  %v1949_v6 = vmul.f32 %v4264_v17, %v1913_v25  ;;  %3455 = vrcp.f32 %v1747_v2  ;;  %v1840_v31 = vmul.f32 %v3448_v56, %v4245_v34  ;;  %v3450_v55 = vpop.eup %3449  ;;  %v2052_v25 = vld [vmem:[%s387_s20 + $0x8] sm:$0xff] }
 0x1f1   : > { %2032 = vadd.xlane.f32.xlu1 %v2031_v58  ;;  %v2034_v50 = vsel %vm1051_vm1, %v1948_v10, 0.0  ;;  %v1950_v32 = vmul.f32 %v4264_v17, %v1914_v63  ;;  %v1916_v47 = vmul.f32 %v1884_v23, %v4320_v18  ;;  %v1870_v33 = vadd.f32 %v4256_v43, %v1834_v22  ;;  %v3452_v59 = vpop.eup %3451 }
 0x1f2   : > { %2035 = vadd.xlane.f32.xlu0 %v2034_v50  ;;  %v2037_v44 = vsel %vm1051_vm1, %v1949_v6, 0.0  ;;  %v2001_v18 = vsel %vm1051_vm1, %v1937_v38, 0.0  ;;  %v1876_v27 = vadd.f32 %v4256_v43, %v1840_v31  ;;  %v1838_v37 = vmul.f32 %v3450_v55, %v4245_v34  ;;  %v3454_v24 = vpop.eup %3453 }
 0x1f3   : > { %v2040_v28 = vsel %vm1051_vm1, %v1950_v32, 0.0  ;;  %v1952_v21 = vmul.f32 %v4264_v17, %v1916_v47  ;;  %v1902_v41 = vmul.f32 %v1870_v33, %v4915_v14  ;;  %v1839_v60 = vmul.f32 %v3452_v59, %v4245_v34 }
 0x1f4   : > { %v1908_v30 = vmul.f32 %v1876_v27, %v4071_v1  ;;  %v1874_v39 = vadd.f32 %v4256_v43, %v1838_v37  ;;  %v1837_v52 = vmul.f32 %v3454_v24, %v4245_v34  ;;  %v4919_v55 = vlaneseq }
 0x1f5   : > { %2038 = vadd.xlane.f32.xlu1 %v2037_v44  ;;  %v2046_v61 = vsel %vm1051_vm1, %v1952_v21, 0.0  ;;  %v1938_v9 = vmul.f32 %v4264_v17, %v1902_v41  ;;  %v1875_v54 = vadd.f32 %v4256_v43, %v1839_v60  ;;  %v4920_v41 = vld [vmem:[#allocation2_spill] sm:$0xff] }
 0x1f6   : > { %2041 = vadd.xlane.f32.xlu0 %v2040_v28  ;;  %v1944_v40 = vmul.f32 %v4264_v17, %v1908_v30  ;;  %v1906_v45 = vmul.f32 %v1874_v39, %v4916_v51  ;;  %v1873_v19 = vadd.f32 %v4256_v43, %v1837_v52  ;;  %v4511_v59 = vand.u32 127, %v4919_v55 }
 0x1f7   : > { %v2004_v57 = vsel %vm1051_vm1, %v1938_v9, 0.0  ;;  %v1907_v62 = vmul.f32 %v1875_v54, %v4917_v0 }
 0x1f8   : > { %v1942_v12 = vmul.f32 %v4264_v17, %v1906_v45  ;;  %v1905_v53 = vmul.f32 %v1873_v19, %v4918_v13  ;;  %v2097_v36 = vadd.s32 4294967288, %v4511_v59  ;;  %v4520_v27 = vsub.s32 %v4511_v59, %v4920_v41 }
 0x1f9   : > { %2002 = vadd.xlane.f32.xlu1 %v2001_v18  ;;  %v1943_v49 = vmul.f32 %v4264_v17, %v1907_v62 }
 0x1fa   : > { %2047 = vadd.xlane.f32.xlu0 %v2046_v61  ;;  %v1941_v5 = vmul.f32 %v4264_v17, %v1905_v53  ;;  %v4523_v37 = vsub.s32 %v2097_v36, %v4920_v41 }
 0x1fc   : > { %v2013_v29 = vsel %vm1051_vm1, %v1941_v5, 0.0 }
 0x1fd   : > { %v3456_v7 = vpop.eup %3455 }
 0x1fe   : > { %2011 = vadd.xlane.f32.xlu0 %v2010_v15  ;;  %v1847_v48 = vmul.f32 %v3456_v7, %v4245_v34  ;;  %v2022_v34 = vsel %vm1051_vm1, %v1944_v40, 0.0 }
 0x200   : > { %v1883_v42 = vadd.f32 %v4256_v43, %v1847_v48  ;;  %v2019_v43 = vsel %vm1051_vm1, %v1943_v49, 0.0 }
 0x202   : > { %2005 = vadd.xlane.f32.xlu0 %v2004_v57  ;;  %v1915_v1 = vmul.f32 %v1883_v42, %v4344_v8  ;;  %v2016_v8 = vsel %vm1051_vm1, %v1942_v12, 0.0 }
 0x204   : > { %v1951_v35 = vmul.f32 %v4264_v17, %v1915_v1 }
 0x206   : > { %2023 = vadd.xlane.f32.xlu0 %v2022_v34  ;;  %v2043_v16 = vsel %vm1051_vm1, %v1951_v35, 0.0 }
 0x207   : > { %2044 = vadd.xlane.f32.xlu1 %v2043_v16 }
 0x20a   : > { %2017 = vadd.xlane.f32.xlu0 %v2016_v8 }
 0x20b   : > { %2020 = vadd.xlane.f32.xlu1 %v2019_v43 }
 0x20f   : > { %2014 = vadd.xlane.f32.xlu1 %v2013_v29 }
 0x220   : > { %2057 = vperm.xlu0 %3302, %v2052_v25   ;;  %2054 = vperm.xlu1 %3301, %v2051_v26  }
 0x247   : > { %v1958_v63 = vpop.xlane.xlu1 %1957 }
 0x248   : > { %v2101_v39 = vrot.slane %v1958_v63, %v4523_v37 }
 0x24a   : > { %v1955_v10 = vpop.xlane.xlu0 %1954 }
 0x24b   : > { %v2096_v30 = vrot.slane %v1955_v10, %v4520_v27 }
 0x24d   : > { %v2103_v51 = vsel %vm2102_vm3, %v2101_v39, %v2096_v30 }
 0x24e   : > { %v1967_v2 = vpop.xlane.xlu1 %1966 }
 0x24f   : > { %v2116_v54 = vrot.slane %v1967_v2, %v4520_v27 }
 0x255   : > { %v1961_v20 = vpop.xlane.xlu0 %1960 }
 0x256   : > { %v2107_v7 = vrot.slane %v1961_v20, %v4520_v27 }
 0x259   : > { %v1964_v58 = vpop.xlane.xlu0 %1963 }
 0x25a   : > { %v2111_v24 = vrot.slane %v1964_v58, %v4523_v37 }
 0x25b   : > { %v1979_v6 = vpop.xlane.xlu1 %1978 }
 0x25c   : > { %v2112_v52 = vsel %vm2102_vm3, %v2111_v24, %v2107_v7  ;;  %v2134_v34 = vrot.slane %v1979_v6, %v4520_v27 }
 0x25d   : > { %v1970_v17 = vpop.xlane.xlu0 %1969  ;;  %v2240_v1 = vsel %vm2239_vm4, %v2112_v52, %v2103_v51 }
 0x25e   : > { %v2120_v60 = vrot.slane %v1970_v17, %v4523_v37 }
 0x25f   : > { %v1973_v23 = vpop.xlane.xlu1 %1972 }
 0x260   : > { %v2125_v42 = vrot.slane %v1973_v23, %v4520_v27  ;;  %v2121_v57 = vsel %vm2102_vm3, %v2120_v60, %v2116_v54 }
 0x261   : > { %v1982_v3 = vpop.xlane.xlu0 %1981  ;;  %v2242_v35 = vsel %vm2241_vm5, %v2121_v57, %v2240_v1 }
 0x262   : > { %v2138_v0 = vrot.slane %v1982_v3, %v4523_v37 }
 0x263   : > { %v1985_v50 = vpop.xlane.xlu1 %1984 }
 0x264   : > { %v2143_v12 = vrot.slane %v1985_v50, %v4520_v27  ;;  %v2139_v13 = vsel %vm2102_vm3, %v2138_v0, %v2134_v34 }
 0x265   : > { %v1976_v32 = vpop.xlane.xlu0 %1975 }
 0x266   : > { %v2129_v48 = vrot.slane %v1976_v32, %v4523_v37 }
 0x267   : > { %v1991_v22 = vpop.xlane.xlu1 %1990 }
 0x268   : > { %v2130_v45 = vsel %vm2102_vm3, %v2129_v48, %v2125_v42  ;;  %v2152_v53 = vrot.slane %v1991_v22, %v4520_v27 }
 0x269   : > { %v1988_v56 = vpop.xlane.xlu0 %1987  ;;  %v2244_v16 = vsel %vm2243_vm6, %v2130_v45, %v2242_v35 }
 0x26a   : > { %v2147_v62 = vrot.slane %v1988_v56, %v4523_v37  ;;  %v2246_v26 = vsel %vm2245_vm7, %v2139_v13, %v2244_v16 }
 0x26b   : > { %v4494_v47 = vpop.xlane.xlu1 %2026 }
 0x26c   : > { %v2148_v8 = vsel %vm2102_vm3, %v2147_v62, %v2143_v12  ;;  %v2206_v58 = vrot.slane %v4494_v47, %v4520_v27 }
 0x26d   : > { %v4496_v44 = vpop.xlane.xlu0 %2029  ;;  %v2248_v17 = vsel %vm2247_vm8, %v2148_v8, %v2246_v26  ;;  %v4922_v26 = vld [vmem:[#allocation4_spill] sm:$0xff] }
 0x26e   : > { %v2210_v25 = vrot.slane %v4496_v44, %v4523_v37 }
 0x26f   : > { %v4498_v46 = vpop.xlane.xlu1 %1996 }
 0x270   : > { %v2161_v23 = vrot.slane %v4498_v46, %v4520_v27  ;;  %v2211_v56 = vsel %vm2102_vm3, %v2210_v25, %v2206_v58  ;;  %v4924_v58 = vld [vmem:[#allocation11_spill] sm:$0xff] }
 0x271   : > { %v1994_v38 = vpop.xlane.xlu0 %1993 }
 0x272   : > { %v2156_v49 = vrot.slane %v1994_v38, %v4523_v37 }
 0x273   : > { %v4502_v28 = vpop.xlane.xlu1 %2008 }
 0x274   : > { %v2157_v10 = vsel %vm2102_vm3, %v2156_v49, %v2152_v53  ;;  %v2179_v3 = vrot.slane %v4502_v28, %v4520_v27 }
 0x275   : > { %v4500_v4 = vpop.xlane.xlu0 %1999  ;;  %v2250_v47 = vsel %vm2249_vm9, %v2157_v10, %v2248_v17  ;;  %v4925_v17 = vld [vmem:[#allocation13_spill] sm:$0xff] }
 0x276   : > { %v2165_v63 = vrot.slane %v4500_v4, %v4523_v37 }
 0x278   : > { %v2166_v28 = vsel %vm2102_vm3, %v2165_v63, %v2161_v23 }
 0x279   : > { %v2252_v7 = vsel %vm2251_vm10, %v2166_v28, %v2250_v47 }
 0x27a   : > { %v4506_v33 = vpop.xlane.xlu1 %2032 }
 0x27b   : > { %v4504_v21 = vpop.xlane.xlu0 %2035  ;;  %v2215_v55 = vrot.slane %v4506_v33, %v4520_v27 }
 0x27c   : > { %v2219_v38 = vrot.slane %v4504_v21, %v4523_v37 }
 0x27e   : > { %v4516_v61 = vpop.xlane.xlu1 %2038  ;;  %v2220_v48 = vsel %vm2102_vm3, %v2219_v38, %v2215_v55 }
 0x27f   : > { %v4508_v31 = vpop.xlane.xlu0 %2041  ;;  %v2224_v33 = vrot.slane %v4516_v61, %v4520_v27 }
 0x280   : > { %v2228_v36 = vrot.slane %v4508_v31, %v4523_v37 }
 0x282   : > { %v2003_v15 = vpop.xlane.xlu1 %2002  ;;  %v2229_v52 = vsel %vm2102_vm3, %v2228_v36, %v2224_v33 }
 0x283   : > { %v4513_v18 = vpop.xlane.xlu0 %2047  ;;  %v2170_v20 = vrot.slane %v2003_v15, %v4520_v27 }
 0x284   : > { %v2237_v60 = vrot.slane %v4513_v18, %v4523_v37 }
 0x287   : > { %v2012_v14 = vpop.xlane.xlu0 %2011 }
 0x288   : > { %v2183_v2 = vrot.slane %v2012_v14, %v4523_v37 }
 0x28a   : > { %v2184_v46 = vsel %vm2102_vm3, %v2183_v2, %v2179_v3  ;;  %v2354_v3 = vsub.s32 6, %v4920_v41 }
 0x28b   : > { %v2006_v9 = vpop.xlane.xlu0 %2005 }
 0x28c   : > { %v2174_v5 = vrot.slane %v2006_v9, %v4523_v37 }
 0x28e   : > { %v2175_v50 = vsel %vm2102_vm3, %v2174_v5, %v2170_v20  ;;  %v4923_v20 = vld [vmem:[#allocation12_spill] sm:$0xff] }
 0x28f   : > { %v2024_v40 = vpop.xlane.xlu0 %2023  ;;  %v2253_v14 = vsel %vm2239_vm4, %v2184_v46, %v2175_v50 }
 0x290   : > { %v2045_v19 = vpop.xlane.xlu1 %2044  ;;  %v2201_v22 = vrot.slane %v2024_v40, %v4523_v37 }
 0x291   : > { %v2233_v21 = vrot.slane %v2045_v19, %v4520_v27 }
 0x293   : > { %v2018_v29 = vpop.xlane.xlu0 %2017  ;;  %v2238_v61 = vsel %vm2102_vm3, %v2237_v60, %v2233_v21  ;;  %v3324_v60 = vld [vmem:[%s4876_s6] sm:$0xff]   ;;  %v4927_v21 = vmov 0.0  }
 0x294   : > { %v2021_v43 = vpop.xlane.xlu1 %2020  ;;  %v2192_v6 = vrot.slane %v2018_v29, %v4523_v37  ;;  %v4921_v29 = vld [vmem:[#allocation5_spill] sm:$0xff] }
 0x295   : > { %v2197_v4 = vrot.slane %v2021_v43, %v4520_v27 }
 0x297   : > { %v2202_v15 = vsel %vm2102_vm3, %v2201_v22, %v2197_v4 }
 0x298   : > { %v2015_v32 = vpop.xlane.xlu1 %2014 }
 0x299   : > { %v2188_v44 = vrot.slane %v2015_v32, %v4520_v27  ;;  %v2365_v32 = vsub.s32 7, %v4920_v41 }
 0x29b   : > { %v2193_v24 = vsel %vm2102_vm3, %v2192_v6, %v2188_v44  ;;  %v2058_v39 = vpop.permute.xlu0 %2057 }
 0x29c   : > { %v2055_v9 = vpop.permute.xlu1 %2054  ;;  %v2254_v30 = vsel %vm2241_vm5, %v2193_v24, %v2253_v14  ;;  %vm2060_vm12 = vcmp.lt.s32.totalorder %v4511_v59, %v2058_v39  ;;  %v4926_v14 = vld [vmem:[#allocation3_spill] sm:$0xff] }
 0x29d   : > { %vm2059_vm11 = vcmp.lt.s32.totalorder %v4511_v59, %v2055_v9  ;;  %v2255_v31 = vsel %vm2243_vm6, %v2202_v15, %v2254_v30  ;;  %v3323_v24 = vld [vmem:[%s4876_s6 + $0x8] sm:$0xff]  }
 0x29e   : > { %v2262_v18 = vsel %vm2059_vm11, %v2252_v7, -1e+30  ;;  %v2256_v54 = vsel %vm2245_vm7, %v2211_v56, %v2255_v31  ;;  %3265 = vmatpush3.bf16.msra.mxu1 %v3323_v24  ;;  %v3481_v7 = vld [vmem:[%s3640_s26 + $0x4] sm:$0xf] }
 0x29f   : > { %v2264_v42 = vsel %vm986_vm0, %v2262_v18, -inf  ;;  %v2257_v57 = vsel %vm2247_vm8, %v2220_v48, %v2256_v54  ;;  %3266 = vmatprep.subr.bf16.mxu1 %v4927_v21  ;;  %v2463_v48 = vunpack.c.l.bf16 %v3481_v7  ;;  %v3492_v7 = vld [vmem:[%s3640_s26 + $0x30] sm:$0xf] }
 0x2a0   : > { %2265 = vmax.xlane.f32.xlu1 %v2264_v42  ;;  %v2258_v40 = vsel %vm2249_vm9, %v2229_v52, %v2257_v57 }
 0x2a1   : > { %v2259_v51 = vsel %vm2251_vm10, %v2238_v61, %v2258_v40 }
 0x2a2   : > { %v2263_v45 = vsel %vm2060_vm12, %v2259_v51, -1e+30  ;;  %3267 = vmatpush3.bf16.msra.mxu1 %v3324_v60  ;;  %v3490_v60 = vld [vmem:[%s3640_s26 + $0x20] sm:$0xf] }
 0x2a3   : > { %v2267_v1 = vsel %vm986_vm0, %v2263_v45, -inf  ;;  %3272 = vmatprep.subr.bf16.mxu1 %v4927_v21 }
 0x2a4   : > { %2268 = vmax.xlane.f32.xlu0 %v2267_v1  ;;  %v3483_v1 = vld [vmem:[%s3640_s26 + $0xc] sm:$0xf] }
 0x329   : > { %v2266_v0 = vpop.xlane.xlu1 %2265 }
 0x32a   : > { %v2270_v62 = vsub.f32 %v2262_v18, %v2266_v0  ;;  %v3482_v18 = vld [vmem:[%s3640_s26] sm:$0xf]  ;;  %v2465_v0 = vunpack.c.l.bf16 %v3483_v1 }
 0x32b   : > { %v2462_v54 = vunpack.c.l.bf16 %v3482_v18  ;;  %v4664_v18 = vld [vmem:[%s3640_s26 + $0x38] sm:$0xf] }
 0x32c   : > { %v2272_v19 = vmul.f32 1.442695, %v2270_v62  ;;  %v3484_v62 = vld [vmem:[%s3640_s26 + $0x8] sm:$0xf] }
 0x32d   : > { %v2269_v35 = vpop.xlane.xlu0 %2268 }
 0x32e   : > { %3457 = vpow2.f32 %v2272_v19  ;;  %v2271_v34 = vsub.f32 %v2263_v45, %v2269_v35  ;;  %v2464_v19 = vunpack.c.l.bf16 %v3484_v62 }
 0x330   : > { %v2274_v59 = vmul.f32 1.442695, %v2271_v34 }
 0x332   : > { %3459 = vpow2.f32 %v2274_v59 }
 0x33b   : > { %v3458_v12 = vpop.eup %3457 }
 0x33c   : > { %v2276_v16 = vsel %vm986_vm0, %v3458_v12, 0.0 }
 0x33d   : > { %2277 = vadd.xlane.f32.xlu1 %v2276_v16 }
 0x33f   : > { %v3460_v49 = vpop.eup %3459 }
 0x340   : > { %v2279_v13 = vsel %vm986_vm0, %v3460_v49, 0.0 }
 0x341   : > { %2280 = vadd.xlane.f32.xlu1 %v2279_v13 }
 0x3c6   : > { %v2278_v53 = vpop.xlane.xlu1 %2277 }
 0x3c7   : > { %3461 = vrcp.f32 %v2278_v53 }
 0x3ca   : > { %v2281_v63 = vpop.xlane.xlu1 %2280 }
 0x3cb   : > { %3463 = vrcp.f32 %v2281_v63  ;;  %v3486_v63 = vld [vmem:[%s3640_s26 + $0x10] sm:$0xf] }
 0x3d4   : > { %v3462_v8 = vpop.eup %3461 }
 0x3d5   : > { %v2284_v43 = vmul.f32 %v3462_v8, %v3458_v12  ;;  %v3485_v8 = vld [vmem:[%s3640_s26 + $0x14] sm:$0xf] }
 0x3d7   : > { %v2289_v5 = vrot.slane %v2284_v43, %v3617_v11  ;;  %v2311_v25 = vrot.slane %v2284_v43, %v4921_v29  ;;  %v2300_v10 = vrot.slane %v2284_v43, %v4922_v26  ;;  %v2322_v2 = vrot.slane %v2284_v43, %v4923_v20 }
 0x3d8   : > { %v2333_v6 = vrot.slane %v2284_v43, %v4924_v58  ;;  %v2344_v23 = vrot.slane %v2284_v43, %v4925_v17  ;;  %v2355_v50 = vrot.slane %v2284_v43, %v2354_v3  ;;  %v3464_v22 = vpop.eup %3463  ;;  %v2366_v44 = vrot.slane %v2284_v43, %v2365_v32 }
 0x3d9   : > { %2295 = vbcast.lane.b32.xlu0 %v2289_v5, 264  ;;  %2291 = vbcast.lane.b32.xlu1 %v2289_v5, 256  ;;  %v2285_v56 = vmul.f32 %v3464_v22, %v3460_v49  ;;  %v2467_v43 = vunpack.c.l.bf16 %v3485_v8 }
 0x3db   : > { %v2399_v47 = vrot.slane %v2285_v56, %v4921_v29  ;;  %v2410_v38 = vrot.slane %v2285_v56, %v4923_v20  ;;  %v2421_v46 = vrot.slane %v2285_v56, %v4924_v58  ;;  %v2377_v4 = vrot.slane %v2285_v56, %v3617_v11 }
 0x3dc   : > { %v2432_v41 = vrot.slane %v2285_v56, %v4925_v17  ;;  %v2443_v28 = vrot.slane %v2285_v56, %v2354_v3  ;;  %v2388_v55 = vrot.slane %v2285_v56, %v4922_v26  ;;  %v2454_v36 = vrot.slane %v2285_v56, %v2365_v32 }
 0x3dd   : > { %2313 = vbcast.lane.b32.xlu0 %v2311_v25, 256  ;;  %2302 = vbcast.lane.b32.xlu1 %v2300_v10, 256 }
 0x3e1   : > { %2324 = vbcast.lane.b32.xlu0 %v2322_v2, 256  ;;  %2306 = vbcast.lane.b32.xlu1 %v2300_v10, 264 }
 0x3e5   : > { %2335 = vbcast.lane.b32.xlu0 %v2333_v6, 256  ;;  %2317 = vbcast.lane.b32.xlu1 %v2311_v25, 264 }
 0x3e9   : > { %2346 = vbcast.lane.b32.xlu0 %v2344_v23, 256  ;;  %2328 = vbcast.lane.b32.xlu1 %v2322_v2, 264  ;;  %v2466_v2 = vunpack.c.l.bf16 %v3486_v63 }
 0x3ed   : > { %2357 = vbcast.lane.b32.xlu0 %v2355_v50, 256  ;;  %2339 = vbcast.lane.b32.xlu1 %v2333_v6, 264 }
 0x3f1   : > { %2368 = vbcast.lane.b32.xlu0 %v2366_v44, 256  ;;  %2350 = vbcast.lane.b32.xlu1 %v2344_v23, 264 }
 0x3f5   : > { %2361 = vbcast.lane.b32.xlu1 %v2355_v50, 264  ;;  %2401 = vbcast.lane.b32.xlu0 %v2399_v47, 256 }
 0x3f9   : > { %2372 = vbcast.lane.b32.xlu1 %v2366_v44, 264  ;;  %2412 = vbcast.lane.b32.xlu0 %v2410_v38, 256 }
 0x3fd   : > { %2423 = vbcast.lane.b32.xlu0 %v2421_v46, 256  ;;  %2379 = vbcast.lane.b32.xlu1 %v2377_v4, 256 }
 0x401   : > { %2434 = vbcast.lane.b32.xlu0 %v2432_v41, 256  ;;  %2383 = vbcast.lane.b32.xlu1 %v2377_v4, 264  ;;  %v3488_v4 = vld [vmem:[%s3640_s26 + $0x18] sm:$0xf] }
 0x405   : > { %2445 = vbcast.lane.b32.xlu0 %v2443_v28, 256  ;;  %2390 = vbcast.lane.b32.xlu1 %v2388_v55, 256 }
 0x409   : > { %2456 = vbcast.lane.b32.xlu0 %v2454_v36, 256  ;;  %2394 = vbcast.lane.b32.xlu1 %v2388_v55, 264 }
 0x40d   : > { %2405 = vbcast.lane.b32.xlu1 %v2399_v47, 264  ;;  %2735 = vrot.lane.b32.xlu0 %v4926_v14, %s3522_s29 }
 0x411   : > { %2416 = vbcast.lane.b32.xlu1 %v2410_v38, 264  ;;  %v3487_v38 = vld [vmem:[%s3640_s26 + $0x1c] sm:$0xf] }
 0x415   : > { %2427 = vbcast.lane.b32.xlu1 %v2421_v46, 264  ;;  %v2469_v46 = vunpack.c.l.bf16 %v3487_v38 }
 0x419   : > { %2438 = vbcast.lane.b32.xlu1 %v2432_v41, 264  ;;  %v2468_v41 = vunpack.c.l.bf16 %v3488_v4 }
 0x41d   : > { %2449 = vbcast.lane.b32.xlu1 %v2443_v28, 264  ;;  %v3489_v28 = vld [vmem:[%s3640_s26 + $0x24] sm:$0xf] }
 0x41e   : > { %v2471_v55 = vunpack.c.l.bf16 %v3489_v28 }
 0x421   : > { %2460 = vbcast.lane.b32.xlu1 %v2454_v36, 264 }
 0x44b   : > { %v2296_v15 = vpop.permute.xlu0 %2295  ;;  %v2292_v9 = vpop.permute.xlu1 %2291 }
 0x44c   : > { %v2495_v42 = vmul.f32 %v2463_v48, %v2296_v15  ;;  %v2494_v57 = vmul.f32 %v2462_v54, %v2292_v9  ;;  %v2470_v15 = vunpack.c.l.bf16 %v3490_v60  ;;  %v2474_v48 = vunpack.c.l.bf16 %v3492_v7  ;;  %v3507_v60 = vld [vmem:[%s3640_s26 + $0x54] sm:$0xf] }
 0x44d   : > { %v2476_v54 = vunpack.c.l.bf16 %v4664_v18 }
 0x44e   : > { %v2527_v51 = vsel %vm986_vm0, %v2495_v42, 0.0  ;;  %v2526_v45 = vsel %vm986_vm0, %v2494_v57, 0.0  ;;  %v3494_v42 = vld [vmem:[%s3640_s26 + $0x2c] sm:$0xf] }
 0x44f   : > { %v2314_v30 = vpop.permute.xlu0 %2313  ;;  %v2303_v39 = vpop.permute.xlu1 %2302  ;;  %v2528_v35 = vadd.f32 %v2527_v51, %v2526_v45  ;;  %v2473_v57 = vunpack.c.l.bf16 %v3494_v42  ;;  %v4669_v51 = vld [vmem:[%s3640_s26 + $0x50] sm:$0xf] }
 0x450   : > { %v2496_v16 = vmul.f32 %v2464_v19, %v2303_v39  ;;  %v2498_v32 = vmul.f32 %v2466_v2, %v2314_v30  ;;  %v3491_v39 = vld [vmem:[%s3640_s26 + $0x28] sm:$0xf]  ;;  %v2482_v45 = vunpack.c.l.bf16 %v4669_v51 }
 0x451   : > { %v2529_v49 = vrot.slane %v2528_v35, 4 }
 0x452   : > { %v2535_v25 = vsel %vm986_vm0, %v2496_v16, 0.0  ;;  %v2544_v14 = vsel %vm986_vm0, %v2498_v32, 0.0  ;;  %v4680_v16 = vld [vmem:[%s3640_s26 + $0x3c] sm:$0xf]  ;;  %v3502_v32 = vld [vmem:[%s3640_s26 + $0x44] sm:$0xf] }
 0x453   : > { %v4627_v33 = vpop.permute.xlu0 %2324  ;;  %v2307_v31 = vpop.permute.xlu1 %2306  ;;  %v2530_v10 = vadd.f32 %v2529_v49, %v2528_v35  ;;  %v4676_v35 = vld [vmem:[%s3640_s26 + $0x58] sm:$0xf]  ;;  %v4684_v49 = vld [vmem:[%s3640_s26 + $0x60] sm:$0xf] }
 0x454   : > { %v2497_v12 = vmul.f32 %v2465_v0, %v2307_v31  ;;  %v2472_v31 = vunpack.c.l.bf16 %v3491_v39  ;;  %v3496_v0 = vld [vmem:[%s3640_s26 + $0x34] sm:$0xf]  ;;  %v4709_v39 = vld [vmem:[%s3640_s26 + $0x5c] sm:$0xf] }
 0x455   : > { %v2531_v50 = vrot.slane %v2530_v10, 2  ;;  %v2475_v62 = vunpack.c.l.bf16 %v3496_v0  ;;  %v2485_v7 = vunpack.c.l.bf16 %v4709_v39 }
 0x456   : > { %v2536_v53 = vsel %vm986_vm0, %v2497_v12, 0.0  ;;  %v2484_v12 = vunpack.c.l.bf16 %v4676_v35 }
 0x457   : > { %v2318_v52 = vpop.permute.xlu1 %2317  ;;  %v4631_v61 = vpop.permute.xlu0 %2335  ;;  %v2537_v6 = vadd.f32 %v2536_v53, %v2535_v25  ;;  %v2532_v36 = vadd.f32 %v2531_v50, %v2530_v10  ;;  %v2486_v53 = vunpack.c.l.bf16 %v4684_v49  ;;  %v3500_v25 = vld [vmem:[%s3640_s26 + $0x40] sm:$0xf]  ;;  %v4728_v50 = vld [vmem:[%s3640_s26 + $0x74] sm:$0xf] }
 0x458   : > { %v2499_v3 = vmul.f32 %v2467_v43, %v2318_v52  ;;  %v2500_v43 = vmul.f32 %v2468_v41, %v4627_v33  ;;  %v2478_v10 = vunpack.c.l.bf16 %v3500_v25  ;;  %v2502_v2 = vmul.f32 %v2470_v15, %v4631_v61  ;;  %v4697_v33 = vld [vmem:[%s3640_s26 + $0x70] sm:$0xf]  ;;  %v4702_v41 = vld [vmem:[%s3640_s26 + $0x78] sm:$0xf]  ;;  %v4718_v61 = vld [vmem:[%s3640_s26 + $0x64] sm:$0xf] }
 0x459   : > { %v2538_v22 = vrot.slane %v2537_v6, 4  ;;  %v2533_v8 = vrot.slane %v2532_v36, 1  ;;  %v2483_v15 = vunpack.c.l.bf16 %v3507_v60  ;;  %v2487_v38 = vunpack.c.l.bf16 %v4718_v61 }
 0x45a   : > { %v2545_v47 = vsel %vm986_vm0, %v2499_v3, 0.0  ;;  %v4691_v3 = vld [vmem:[%s3640_s26 + $0x68] sm:$0xf]  ;;  %v2553_v42 = vsel %vm986_vm0, %v2500_v43, 0.0 }
 0x45b   : > { %v2329_v40 = vpop.permute.xlu1 %2328  ;;  %v4637_v34 = vpop.permute.xlu0 %2346  ;;  %v2539_v24 = vadd.f32 %v2538_v22, %v2537_v6  ;;  %v2546_v30 = vadd.f32 %v2545_v47, %v2544_v14  ;;  %v2479_v22 = vunpack.c.l.bf16 %v3502_v32 }
 0x45c   : > { %v2501_v52 = vmul.f32 %v2469_v46, %v2329_v40  ;;  %v2477_v40 = vunpack.c.l.bf16 %v4680_v16  ;;  %v3504_v46 = vld [vmem:[%s3640_s26 + $0x48] sm:$0xf]  ;;  %v2504_v25 = vmul.f32 %v2472_v31, %v4637_v34 }
 0x45d   : > { %v2547_v6 = vrot.slane %v2546_v30, 4  ;;  %v2480_v4 = vunpack.c.l.bf16 %v3504_v46  ;;  %v2562_v46 = vsel %vm986_vm0, %v2502_v2, 0.0  ;;  %v4732_v2 = vld [vmem:[%s3640_s26 + $0x7c] sm:$0xf] }
 0x45e   : > { %v2554_v47 = vsel %vm986_vm0, %v2501_v52, 0.0  ;;  %v4712_v52 = vadd.f32 %v2533_v8, %v2532_v36 }
 0x45f   : > { %v2340_v59 = vpop.permute.xlu1 %2339  ;;  %v4643_v5 = vpop.permute.xlu0 %2357  ;;  %v2555_v60 = vadd.f32 %v2554_v47, %v2553_v42 }
 0x460   : > { %v2503_v19 = vmul.f32 %v2471_v55, %v2340_v59  ;;  %v2540_v59 = vrot.slane %v2539_v24, 2  ;;  %v3506_v55 = vld [vmem:[%s3640_s26 + $0x4c] sm:$0xf]  ;;  %v2506_v36 = vmul.f32 %v2474_v48, %v4643_v5  ;;  %v2672_v5 = vpack.c.bf16 %v4712_v52, %v4712_v52 }
 0x461   : > { %v2481_v14 = vunpack.c.l.bf16 %v3506_v55  ;;  %v2548_v55 = vadd.f32 %v2547_v6, %v2546_v30  ;;  %v2491_v30 = vunpack.c.l.bf16 %v4728_v50 }
 0x462   : > { %v2563_v28 = vsel %vm986_vm0, %v2503_v19, 0.0  ;;  %v2541_v0 = vadd.f32 %v2540_v59, %v2539_v24  ;;  %v4724_v24 = vld [vmem:[%s3640_s26 + $0x6c] sm:$0xf]  ;;  %v2580_v42 = vsel %vm986_vm0, %v2506_v36, 0.0 }
 0x463   : > { %v4639_v13 = vpop.permute.xlu1 %2350  ;;  %v4649_v56 = vpop.permute.xlu0 %2368  ;;  %v2564_v8 = vadd.f32 %v2563_v28, %v2562_v46  ;;  %v2489_v34 = vunpack.c.l.bf16 %v4724_v24  ;;  %v2549_v28 = vrot.slane %v2548_v55, 2 }
 0x464   : > { %v2505_v43 = vmul.f32 %v2473_v57, %v4639_v13  ;;  %v2542_v48 = vrot.slane %v2541_v0, 1  ;;  %v2571_v13 = vsel %vm986_vm0, %v2504_v25, 0.0 }
 0x466   : > { %v2572_v46 = vsel %vm986_vm0, %v2505_v43, 0.0 }
 0x467   : > { %v4647_v23 = vpop.permute.xlu1 %2361  ;;  %v4672_v1 = vpop.permute.xlu0 %2401 }
 0x468   : > { %v2507_v57 = vmul.f32 %v2475_v62, %v4647_v23  ;;  %v2514_v23 = vmul.f32 %v2482_v45, %v4672_v1 }
 0x46a   : > { %v2581_v36 = vsel %vm986_vm0, %v2507_v57, 0.0 }
 0x46b   : > { %v4651_v44 = vpop.permute.xlu1 %2372  ;;  %v2413_v32 = vpop.permute.xlu0 %2412 }
 0x46c   : > { %v2509_v52 = vmul.f32 %v2477_v40, %v4651_v44  ;;  %v2550_v40 = vadd.f32 %v2549_v28, %v2548_v55 }
 0x46f   : > { %v4659_v9 = vpop.permute.xlu1 %2379  ;;  %v2424_v6 = vpop.permute.xlu0 %2423 }
 0x473   : > { %v2384_v63 = vpop.permute.xlu1 %2383 }
 0x474   : > { %v2511_v31 = vmul.f32 %v2479_v22, %v2384_v63  ;;  %v2556_v63 = vrot.slane %v2555_v60, 4  ;;  %v2510_v22 = vmul.f32 %v2478_v10, %v4659_v9  ;;  %v2543_v10 = vadd.f32 %v2542_v48, %v2541_v0 }
 0x475   : > { %v2616_v0 = vsel %vm986_vm0, %v2514_v23, 0.0  ;;  %v2582_v48 = vadd.f32 %v2581_v36, %v2580_v42  ;;  %v4768_v23 = vunpack.c.l.b16 %v2672_v5 }
 0x476   : > { %v2599_v62 = vsel %vm986_vm0, %v2511_v31, 0.0  ;;  %v2557_v43 = vadd.f32 %v2556_v63, %v2555_v60  ;;  %v2598_v51 = vsel %vm986_vm0, %v2510_v22, 0.0  ;;  %v2573_v31 = vadd.f32 %v2572_v46, %v2571_v13  ;;  %v2435_v60 = vpop.permute.xlu0 %2434 }
 0x477   : > { %v2391_v19 = vpop.permute.xlu1 %2390  ;;  %v2518_v46 = vmul.f32 %v2486_v53, %v2424_v6 }
 0x478   : > { %v2512_v59 = vmul.f32 %v2480_v4, %v2391_v19  ;;  %v2565_v19 = vrot.slane %v2564_v8, 4  ;;  %v2558_v13 = vrot.slane %v2557_v43, 2  ;;  %v2574_v42 = vrot.slane %v2573_v31, 4 }
 0x47a   : > { %v2607_v25 = vsel %vm986_vm0, %v2512_v59, 0.0  ;;  %v2566_v1 = vadd.f32 %v2565_v19, %v2564_v8  ;;  %v2590_v59 = vsel %vm986_vm0, %v2509_v52, 0.0  ;;  %v2551_v8 = vrot.slane %v2550_v40, 1  ;;  %v2446_v53 = vpop.permute.xlu0 %2445 }
 0x47b   : > { %v2395_v47 = vpop.permute.xlu1 %2394 }
 0x47c   : > { %v2513_v4 = vmul.f32 %v2481_v14, %v2395_v47  ;;  %v2508_v14 = vmul.f32 %v2476_v54, %v4649_v56  ;;  %v2600_v47 = vadd.f32 %v2599_v62, %v2598_v51  ;;  %v2516_v56 = vmul.f32 %v2484_v12, %v2413_v32 }
 0x47d   : > { %v2673_v54 = vpack.c.bf16 %v2543_v10, %v2543_v10  ;;  %v2583_v12 = vrot.slane %v2582_v48, 4  ;;  %v2575_v51 = vadd.f32 %v2574_v42, %v2573_v31 }
 0x47e   : > { %v2608_v9 = vsel %vm986_vm0, %v2513_v4, 0.0  ;;  %v2589_v55 = vsel %vm986_vm0, %v2508_v14, 0.0  ;;  %v2567_v4 = vrot.slane %v2566_v1, 2  ;;  %v2601_v19 = vrot.slane %v2600_v47, 4 }
 0x47f   : > { %v2609_v16 = vadd.f32 %v2608_v9, %v2607_v25  ;;  %v2406_v44 = vpop.permute.xlu1 %2405  ;;  %v2591_v63 = vadd.f32 %v2590_v59, %v2589_v55  ;;  %v2625_v32 = vsel %vm986_vm0, %v2516_v56, 0.0  ;;  %v4770_v62 = vunpack.c.l.b16 %v2673_v54 }
 0x480   : > { %v2515_v45 = vmul.f32 %v2483_v15, %v2406_v44  ;;  %v2559_v44 = vadd.f32 %v2558_v13, %v2557_v43  ;;  %v2602_v49 = vadd.f32 %v2601_v19, %v2600_v47  ;;  %v2584_v5 = vadd.f32 %v2583_v12, %v2582_v48 }
 0x481   : > { %v2610_v57 = vrot.slane %v2609_v16, 4  ;;  %v2592_v10 = vrot.slane %v2591_v63, 4  ;;  %v2634_v59 = vsel %vm986_vm0, %v2518_v46, 0.0  ;;  %v2576_v47 = vrot.slane %v2575_v51, 2 }
 0x482   : > { %v2617_v18 = vsel %vm986_vm0, %v2515_v45, 0.0  ;;  %v4776_v45 = vadd.f32 %v2567_v4, %v2566_v1  ;;  %v2603_v48 = vrot.slane %v2602_v49, 2  ;;  %v2585_v13 = vrot.slane %v2584_v5, 2 }
 0x483   : > { %v2618_v28 = vadd.f32 %v2617_v18, %v2616_v0  ;;  %v2417_v15 = vpop.permute.xlu1 %2416  ;;  %v2611_v25 = vadd.f32 %v2610_v57, %v2609_v16  ;;  %v2593_v43 = vadd.f32 %v2592_v10, %v2591_v63  ;;  %v2457_v63 = vpop.permute.xlu0 %2456 }
 0x484   : > { %v2517_v22 = vmul.f32 %v2485_v7, %v2417_v15  ;;  %v4772_v7 = vadd.f32 %v2551_v8, %v2550_v40  ;;  %v4928_v40 = vunpack.c.l.bf16 %v4691_v3  ;;  %v2569_v3 = vrot.slane %v4776_v45, 1 }
 0x485   : > { %v2619_v35 = vrot.slane %v2618_v28, 4  ;;  %v2612_v56 = vrot.slane %v2611_v25, 2  ;;  %v2604_v46 = vadd.f32 %v2603_v48, %v2602_v49 }
 0x486   : > { %v2626_v52 = vsel %vm986_vm0, %v2517_v22, 0.0  ;;  %v2520_v0 = vmul.f32 %v4928_v40, %v2435_v60  ;;  %v4929_v60 = vunpack.c.l.bf16 %v4697_v33 }
 0x487   : > { %v2627_v9 = vadd.f32 %v2626_v52, %v2625_v32  ;;  %v2428_v39 = vpop.permute.xlu1 %2427  ;;  %v2620_v14 = vadd.f32 %v2619_v35, %v2618_v28  ;;  %v2560_v28 = vrot.slane %v2559_v44, 1  ;;  %v2613_v4 = vadd.f32 %v2612_v56, %v2611_v25 }
 0x488   : > { %v2519_v36 = vmul.f32 %v2487_v38, %v2428_v39  ;;  %v2674_v38 = vpack.c.bf16 %v4772_v7, %v4772_v7  ;;  %v2522_v15 = vmul.f32 %v4929_v60, %v2446_v53  ;;  %v2643_v22 = vsel %vm986_vm0, %v2520_v0, 0.0 }
 0x489   : > { %v2628_v6 = vrot.slane %v2627_v9, 4  ;;  %v2621_v31 = vrot.slane %v2620_v14, 2  ;;  %v2577_v32 = vadd.f32 %v2576_v47, %v2575_v51  ;;  %v4930_v39 = vunpack.c.l.bf16 %v4702_v41 }
 0x48a   : > { %v2635_v16 = vsel %vm986_vm0, %v2519_v36, 0.0  ;;  %v2586_v53 = vadd.f32 %v2585_v13, %v2584_v5  ;;  %v4931_v51 = vunpack.c.l.bf16 %v4732_v2  ;;  %v2605_v56 = vrot.slane %v2604_v46, 1 }
 0x48b   : > { %v2629_v18 = vadd.f32 %v2628_v6, %v2627_v9  ;;  %v2636_v54 = vadd.f32 %v2635_v16, %v2634_v59  ;;  %v2439_v61 = vpop.permute.xlu1 %2438  ;;  %v2622_v19 = vadd.f32 %v2621_v31, %v2620_v14  ;;  %v2652_v9 = vsel %vm986_vm0, %v2522_v15, 0.0 }
 0x48c   : > { %v2521_v1 = vmul.f32 %v2489_v34, %v2439_v61  ;;  %v2594_v34 = vrot.slane %v2593_v43, 2  ;;  %v2524_v10 = vmul.f32 %v4930_v39, %v2457_v63  ;;  %v2614_v6 = vrot.slane %v2613_v4, 1 }
 0x48d   : > { %v2630_v55 = vrot.slane %v2629_v18, 2  ;;  %v2637_v57 = vrot.slane %v2636_v54, 4  ;;  %v2623_v50 = vrot.slane %v2622_v19, 1  ;;  %v2578_v0 = vrot.slane %v2577_v32, 1 }
 0x48e   : > { %v2644_v8 = vsel %vm986_vm0, %v2521_v1, 0.0  ;;  %v2595_v40 = vadd.f32 %v2594_v34, %v2593_v43  ;;  %v2661_v41 = vsel %vm986_vm0, %v2524_v10, 0.0  ;;  %v2561_v1 = vadd.f32 %v2560_v28, %v2559_v44 }
 0x48f   : > { %v2638_v42 = vadd.f32 %v2637_v57, %v2636_v54  ;;  %v2450_v24 = vpop.permute.xlu1 %2449  ;;  %v2645_v35 = vadd.f32 %v2644_v8, %v2643_v22  ;;  %v2631_v52 = vadd.f32 %v2630_v55, %v2629_v18  ;;  %v2615_v47 = vadd.f32 %v2614_v6, %v2613_v4 }
 0x490   : > { %v2523_v12 = vmul.f32 %v2491_v30, %v2450_v24  ;;  %v2587_v43 = vrot.slane %v2586_v53, 1  ;;  %v2596_v57 = vrot.slane %v2595_v40, 1  ;;  %v2624_v60 = vadd.f32 %v2623_v50, %v2622_v19 }
 0x491   : > { %v2639_v33 = vrot.slane %v2638_v42, 2  ;;  %v2646_v36 = vrot.slane %v2645_v35, 4  ;;  %v2632_v18 = vrot.slane %v2631_v52, 1  ;;  %v2606_v2 = vadd.f32 %v2605_v56, %v2604_v46 }
 0x492   : > { %v2653_v25 = vsel %vm986_vm0, %v2523_v12, 0.0  ;;  %v2570_v63 = vadd.f32 %v2569_v3, %v4776_v45  ;;  %v2681_v12 = vpack.c.bf16 %v2615_v47, %v2615_v47  ;;  %v2588_v28 = vadd.f32 %v2587_v43, %v2586_v53 }
 0x493   : > { %v2640_v59 = vadd.f32 %v2639_v33, %v2638_v42  ;;  %v2654_v14 = vadd.f32 %v2653_v25, %v2652_v9  ;;  %v2461_v16 = vpop.permute.xlu1 %2460  ;;  %v2647_v30 = vadd.f32 %v2646_v36, %v2645_v35  ;;  %v2633_v8 = vadd.f32 %v2632_v18, %v2631_v52 }
 0x494   : > { %v2525_v49 = vmul.f32 %v4931_v51, %v2461_v16  ;;  %v2579_v42 = vadd.f32 %v2578_v0, %v2577_v32  ;;  %v2675_v35 = vpack.c.bf16 %v2561_v1, %v2561_v1  ;;  %v2597_v4 = vadd.f32 %v2596_v57, %v2595_v40 }
 0x495   : > { %v2655_v54 = vrot.slane %v2654_v14, 4  ;;  %v2641_v61 = vrot.slane %v2640_v59, 1  ;;  %v2648_v31 = vrot.slane %v2647_v30, 2  ;;  %v2682_v9 = vpack.c.bf16 %v2624_v60, %v2624_v60 }
 0x496   : > { %v2662_v5 = vsel %vm986_vm0, %v2525_v49, 0.0  ;;  %v2680_v10 = vpack.c.bf16 %v2606_v2, %v2606_v2  ;;  %v2683_v19 = vpack.c.bf16 %v2633_v8, %v2633_v8  ;;  %v2706_v52 = vunpack.c.l.b16 %v2674_v38 }
 0x497   : > { %v2656_v48 = vadd.f32 %v2655_v54, %v2654_v14  ;;  %v2663_v55 = vadd.f32 %v2662_v5, %v2661_v41  ;;  %v2649_v15 = vadd.f32 %v2648_v31, %v2647_v30  ;;  %v2642_v24 = vadd.f32 %v2641_v61, %v2640_v59 }
 0x498   : > { %v2676_v45 = vpack.c.bf16 %v2570_v63, %v2570_v63  ;;  %v2677_v3 = vpack.c.bf16 %v2579_v42, %v2579_v42  ;;  %v2713_v25 = vunpack.c.l.b16 %v2681_v12  ;;  %v2707_v16 = vunpack.c.l.b16 %v2675_v35  ;;  %v3325_v35 = vld [vmem:[%s4878_s8 + $0x18] sm:$0xff]   ;;  %v3326_v12 = vld [vmem:[%s4878_s8 + $0x10] sm:$0xff]  }
 0x499   : > { %v2657_v13 = vrot.slane %v2656_v48, 2  ;;  %v2664_v22 = vrot.slane %v2663_v55, 4  ;;  %v2650_v34 = vrot.slane %v2649_v15, 1  ;;  %v2684_v32 = vpack.c.bf16 %v2642_v24, %v2642_v24 }
 0x49a   : > { %v2678_v53 = vpack.c.bf16 %v2588_v28, %v2588_v28  ;;  %v2679_v40 = vpack.c.bf16 %v2597_v4, %v2597_v4  ;;  %v2714_v50 = vunpack.c.l.b16 %v2682_v9  ;;  %v2712_v30 = vunpack.c.l.b16 %v2680_v10  ;;  %v2670_v28 = vld [vmem:[%s4877_s7] sm:$0x1f] }
 0x49b   : > { %v2658_v33 = vadd.f32 %v2657_v13, %v2656_v48  ;;  %v2665_v44 = vadd.f32 %v2664_v22, %v2663_v55  ;;  %v2651_v39 = vadd.f32 %v2650_v34, %v2649_v15  ;;  %v2715_v51 = vunpack.c.l.b16 %v2683_v19  ;;  %v2736_v22 = vpop.permute.xlu0 %2735 }
 0x49c   : > { %v2720_v7 = vsel %vm2239_vm4, %v4770_v62, %v4768_v23  ;;  %v2708_v38 = vunpack.c.l.b16 %v2676_v45  ;;  %v2716_v56 = vunpack.c.l.b16 %v2684_v32  ;;  %v2709_v18 = vunpack.c.l.b16 %v2677_v3 }
 0x49d   : > { %v2659_v36 = vrot.slane %v2658_v33, 1  ;;  %v2666_v46 = vrot.slane %v2665_v44, 2  ;;  %v2685_v6 = vpack.c.bf16 %v2651_v39, %v2651_v39  ;;  %v2727_v54 = vsel %vm2239_vm4, %v2713_v25, %v2712_v30 }
 0x49e   : > { %v2721_v31 = vsel %vm2241_vm5, %v2706_v52, %v2720_v7  ;;  %v2710_v5 = vunpack.c.l.b16 %v2678_v53  ;;  %v2728_v1 = vsel %vm2241_vm5, %v2714_v50, %v2727_v54  ;;  %v2711_v55 = vunpack.c.l.b16 %v2679_v40 }
 0x49f   : > { %v2660_v59 = vadd.f32 %v2659_v36, %v2658_v33  ;;  %v2667_v14 = vadd.f32 %v2666_v46, %v2665_v44  ;;  %v2717_v41 = vunpack.c.l.b16 %v2685_v6  ;;  %v2722_v48 = vsel %vm2243_vm6, %v2707_v16, %v2721_v31  ;;  %v3327_v33 = vld [vmem:[%s4878_s8 + $0x8] sm:$0xff]   ;;  %v3328_v44 = vld [vmem:[%s4878_s8] sm:$0xff]  }
 0x4a0   : > { %v2729_v43 = vsel %vm2243_vm6, %v2715_v51, %v2728_v1  ;;  %v2723_v23 = vsel %vm2245_vm7, %v2708_v38, %v2722_v48  ;;  %v2747_v4 = vrot.slane %v2670_v28, %v3617_v11  ;;  %v2806_v9 = vrot.slane %v2670_v28, %v4922_v26 }
 0x4a1   : > { %v2686_v49 = vpack.c.bf16 %v2660_v59, %v2660_v59  ;;  %v2668_v0 = vrot.slane %v2667_v14, 1  ;;  %v2730_v62 = vsel %vm2245_vm7, %v2716_v56, %v2729_v43  ;;  %v2724_v15 = vsel %vm2247_vm8, %v2709_v18, %v2723_v23 }
 0x4a2   : > { %v2731_v2 = vsel %vm2247_vm8, %v2717_v41, %v2730_v62  ;;  %v2725_v8 = vsel %vm2249_vm9, %v2710_v5, %v2724_v15  ;;  %v2812_v19 = vrot.slane %v2670_v28, %v4921_v29  ;;  %v2830_v50 = vrot.slane %v2670_v28, %v4924_v58 }
 0x4a3   : > { %v2669_v61 = vadd.f32 %v2668_v0, %v2667_v14  ;;  %v2718_v47 = vunpack.c.l.b16 %v2686_v49  ;;  %v2726_v63 = vsel %vm2251_vm10, %v2711_v55, %v2725_v8  ;;  %v2836_v49 = vrot.slane %v2670_v28, %v4923_v20 }
 0x4a5   : > { %v2687_v57 = vpack.c.bf16 %v2669_v61, %v2669_v61  ;;  %v2732_v13 = vsel %vm2249_vm9, %v2718_v47, %v2731_v2  ;;  %v2671_v61 = vld [vmem:[%s4879_s9] sm:$0x3f] }
 0x4a6   : > { %v2853_v31 = vrot.slane %v2671_v61, %v3617_v11  ;;  %v2926_v5 = vrot.slane %v2671_v61, %v4922_v26  ;;  %v2932_v48 = vrot.slane %v2671_v61, %v4921_v29  ;;  %v2950_v29 = vrot.slane %v2671_v61, %v4924_v58 }
 0x4a7   : > { %v2719_v60 = vunpack.c.l.b16 %v2687_v57 }
 0x4a9   : > { %v2733_v42 = vsel %vm2251_vm10, %v2719_v60, %v2732_v13 }
 0x4aa   : > { %v2734_v24 = vpack.c.b16 %v2733_v42, %v2726_v63  ;;  %v2956_v42 = vrot.slane %v2671_v61, %v4923_v20 }
 0x4ac   : > { %v2739_v34 = vsel %vm986_vm0, %v2734_v24, %v2736_v22 }
 0x4ad   : > { %3269 = vmatmul.mubr.msk.bf16.vlgmr.msra.gmra.mxu1 %vm1051_vm1, %v2739_v34 }
 0x4ae   : > { %3280 = vmatprep.mubr.msk.bf16.mxu1 %vm3524_vm2, %v4927_v21  ;;  %3273 = vmatpush3.bf16.msra.mxu1 %v3325_v35 }
 0x4af   : > { %3274 = vmatprep.subr.bf16.mxu1 %v4927_v21 }
 0x4b2   : > { %3275 = vmatpush3.bf16.msra.mxu1 %v3326_v12  ;;  %v2964_v12 = vrot.slane %v2671_v61, %v4925_v17 }
 0x4b3   : > { %3276 = vmatprep.subr.bf16.mxu1 %v4927_v21 }
 0x4b6   : > { %3277 = vmatpush3.bf16.msra.mxu1 %v3327_v33 }
 0x4b7   : > { %3278 = vmatprep.subr.bf16.mxu1 %v4927_v21 }
 0x4ba   : > { %3279 = vmatpush3.bf16.msra.mxu1 %v3328_v44 }
 0x56d   : > { %v2796_v39 = vpop.f32.mrf.mxu1 }
 0x56e   : > { %v2797_v10 = vadd.f32 %v2796_v39, %v2747_v4 }
 0x56f   : > { %v3270_v36 = vpop.f32.mrf.mxu1 }
 0x570   : > { %v2807_v46 = vmul.f32 %v2806_v9, %v2797_v10 }
 0x571   : > { %v2799_v52 = vpop.f32.mrf.mxu1 }
 0x572   : > { %v2813_v45 = vadd.f32 %v2812_v19, %v2807_v46  ;;  %v2800_v3 = vadd.f32 %v2799_v52, %v2747_v4 }
 0x573   : > { %v3271_v32 = vpop.f32.mrf.mxu1 }
 0x574   : > { %v3182_v21 = vmul.f32 -1.442695, %v2813_v45  ;;  %v2808_v25 = vmul.f32 %v2806_v9, %v2800_v3 }
 0x576   : > { %3465 = vpow2.f32 %v3182_v21  ;;  %v2814_v6 = vadd.f32 %v2812_v19, %v2808_v25 }
 0x578   : > { %v3183_v59 = vmul.f32 -1.442695, %v2814_v6 }
 0x57a   : > { %3467 = vpow2.f32 %v3183_v59 }
 0x583   : > { %v3466_v14 = vpop.eup %3465 }
 0x584   : > { %v2821_v16 = vadd.f32 1.0, %v3466_v14 }
 0x586   : > { %3469 = vrcp.f32 %v2821_v16 }
 0x587   : > { %v3468_v53 = vpop.eup %3467 }
 0x588   : > { %v2822_v40 = vadd.f32 1.0, %v3468_v53 }
 0x58a   : > { %3471 = vrcp.f32 %v2822_v40 }
 0x593   : > { %v3470_v30 = vpop.eup %3469 }
 0x594   : > { %v2831_v51 = vmul.f32 %v3470_v30, %v2830_v50 }
 0x596   : > { %v2837_v7 = vadd.f32 %v2836_v49, %v2831_v51 }
 0x597   : > { %v3472_v0 = vpop.eup %3471 }
 0x598   : > { %v2832_v38 = vmul.f32 %v3472_v0, %v2830_v50  ;;  %v2839_v18 = vmul.f32 %v2837_v7, %v2797_v10 }
 0x59a   : > { %v2838_v56 = vadd.f32 %v2836_v49, %v2832_v38 }
 0x59c   : > { %v2840_v54 = vmul.f32 %v2838_v56, %v2800_v3 }
 0x59e   : > { %v2841_v41 = vpack.c.bf16 %v2840_v54, %v2839_v18 }
 0x5a0   : > { %3281 = vmatmul.mubr.msk.bf16.vlgmr.msra.gmra.mxu1 %vm2878_vm13, %v2841_v41 }
 0x660   : > { %v2916_v1 = vpop.f32.mrf.mxu1 }
 0x661   : > { %v2917_v47 = vadd.f32 %v2916_v1, %v2853_v31 }
 0x662   : > { %v3282_v55 = vpop.f32.mrf.mxu1 }
 0x663   : > { %v2927_v43 = vmul.f32 %v2926_v5, %v2917_v47 }
 0x664   : > { %v2919_v57 = vpop.f32.mrf.mxu1 }
 0x665   : > { %v2933_v23 = vadd.f32 %v2932_v48, %v2927_v43  ;;  %v2920_v62 = vadd.f32 %v2919_v57, %v2853_v31 }
 0x666   : > { %v3283_v60 = vpop.f32.mrf.mxu1 }
 0x667   : > { %v3189_v15 = vmul.f32 -1.442695, %v2933_v23  ;;  %v2928_v2 = vmul.f32 %v2926_v5, %v2920_v62 }
 0x669   : > { %3473 = vpow2.f32 %v3189_v15  ;;  %v2934_v8 = vadd.f32 %v2932_v48, %v2928_v2 }
 0x66b   : > { %v3190_v13 = vmul.f32 -1.442695, %v2934_v8 }
 0x66d   : > { %3475 = vpow2.f32 %v3190_v13 }
 0x676   : > { %v3474_v22 = vpop.eup %3473 }
 0x677   : > { %v2941_v11 = vadd.f32 1.0, %v3474_v22 }
 0x679   : > { %3477 = vrcp.f32 %v2941_v11 }
 0x67a   : > { %v3476_v26 = vpop.eup %3475 }
 0x67b   : > { %v2942_v63 = vadd.f32 1.0, %v3476_v26 }
 0x67d   : > { %3479 = vrcp.f32 %v2942_v63 }
 0x686   : > { %v3478_v24 = vpop.eup %3477 }
 0x687   : > { %v2951_v34 = vmul.f32 %v3478_v24, %v2950_v29 }
 0x689   : > { %v2957_v35 = vadd.f32 %v2956_v42, %v2951_v34 }
 0x68a   : > { %v3480_v33 = vpop.eup %3479 }
 0x68b   : > { %v2959_v44 = vmul.f32 %v2957_v35, %v2917_v47  ;;  %v2952_v28 = vmul.f32 %v3480_v33, %v2950_v29 }
 0x68d   : > { %v2958_v4 = vadd.f32 %v2956_v42, %v2952_v28  ;;  %v2965_v9 = vmul.f32 %v2964_v12, %v2959_v44 }
 0x68f   : > { %v2960_v39 = vmul.f32 %v2958_v4, %v2920_v62  ;;  %v2967_v10 = vsel %vm1051_vm1, %v2965_v9, 0.0 }
 0x690   : > { %2968 = vadd.xlane.f32.xlu1 %v2967_v10 }
 0x691   : > { %v2966_v19 = vmul.f32 %v2964_v12, %v2960_v39 }
 0x693   : > { %v2970_v58 = vsel %vm1051_vm1, %v2966_v19, 0.0 }
 0x694   : > { %2971 = vadd.xlane.f32.xlu0 %v2970_v58 }
 0x719   : > { %v2969_v20 = vpop.xlane.xlu1 %2968 }
 0x71a   : > { %v2978_v46 = vrot.slane %v2969_v20, %v4520_v27 }
 0x71d   : > { %v2972_v36 = vpop.xlane.xlu0 %2971 }
 0x71e   : > { %v2982_v17 = vrot.slane %v2972_v36, %v4523_v37 }
 0x720   : > { %v2983_v52 = vsel %vm2102_vm3, %v2982_v17, %v2978_v46 }
 0x721   : > { %2986 = vst.msk [vmem:[%s404_s15] sm:$0x1] %vm2985_vm14, %v2983_v52 }
 0x722 PF: > { %s20_s13 = sadd.s32 1, %s3519_s13  }
 0x723   : > { %p17_p6 = scmp.ge.s32.totalorder %s20_s13, 4  }
 0x725   :  { %19 = sbr.rel (!%p17_p6) target bundleno = 1 (0x1), region = 96 }

</bundles_post_ra>
